<compile_context>
chip_gen: v7x
topology: tpu7x:2x2x1
jax: 0.10.0
libtpu: 0.0.40
codegen_flags: <defaults>
</compile_context>

<pallas_src>
import functools

import jax
import jax.numpy as jnp
from jax import lax
from jax.experimental import pallas as pl
from jax.experimental.pallas import tpu as pltpu

F32 = jnp.float32
BF16 = jnp.bfloat16


# ---------------------- shared math (kernel + reference) ---------------------
def _three_nn_weights(uT, k):
    """uT: (3, N) f32 unknown xyz (channel-major), k: (m, 3) f32 known xyz.
    Returns the dense normalized 3-NN interpolation weight matrix (m, N),
    matching pointnet2.three_nn (first-index tie-break) + 1/(dist + 1e-8)."""
    n = uT.shape[1]
    m = k.shape[0]
    # diff-based squared distances: 3 broadcast (m,1)-(1,N) VPU terms, f32
    d2 = None
    for c in range(3):
        diff = k[:, c:c + 1] - uT[c:c + 1, :]
        sq = diff * diff
        d2 = sq if d2 is None else d2 + sq
    row = lax.broadcasted_iota(jnp.int32, (m, n), 0)
    work = d2
    w_mat = jnp.zeros((m, n), F32)
    w_sum = jnp.zeros((1, n), F32)
    for _ in range(3):  # 3 nearest neighbours
        dmin = jnp.min(work, axis=0, keepdims=True)                    # (1, N)
        jmin = jnp.min(jnp.where(work == dmin, row, m), axis=0, keepdims=True)
        pick = row == jmin
        # sqrt only on the selected (1, N) minima, not the full (m, N) matrix
        wt = 1.0 / (jnp.sqrt(jnp.maximum(dmin, 0.0)) + 1e-8)
        w_mat = w_mat + jnp.where(pick, wt, 0.0)
        w_sum = w_sum + wt
        work = jnp.where(pick, jnp.float32(jnp.inf), work)
    return w_mat * (1.0 / w_sum)


def _fp_mlp(w_mat, kfw0a, uf, w0b, w1, s0, sh0, s1, sh1):
    """three_interpolate fused with the first shared-MLP conv (channel-major).
    kfw0a = w0a @ known_feats is precomputed per batch; matmuls run in bf16
    with f32 accumulation.  Returns (d_model, N) with points on lanes."""
    y0 = (jnp.dot(kfw0a, w_mat.astype(BF16), preferred_element_type=F32)
          + jnp.dot(w0b, uf, preferred_element_type=F32))            # (hid, N)
    h = jnp.maximum(y0 * s0 + sh0, 0.0)
    y1 = jnp.dot(w1, h.astype(BF16), preferred_element_type=F32)     # (d,  N)
    return jnp.maximum(y1 * s1 + sh1, 0.0)


def _layer_norm_cm(x, g, b):
    """LayerNorm over the channel axis (axis 0) of a (d, N) slab."""
    mu = jnp.mean(x, axis=0, keepdims=True)
    var = jnp.mean((x - mu) ** 2, axis=0, keepdims=True)
    return (x - mu) * lax.rsqrt(var + 1e-5) * g + b


def _encoder_layer(x_q, x_all, wqkv, wo, w1f, w2f,
                   bq, bk, bv, bo, g1, be1, b1f, b2f, g2, be2, nhead):
    """Post-norm TransformerEncoderLayer (eval mode, dropout = identity),
    channel-major: x_q (d, nq) query tile, x_all (d, n) key/value source."""
    d, nq = x_q.shape
    hd = d // nhead
    scale = 1.0 / jnp.sqrt(jnp.float32(hd))
    # fused projections: Q for the query tile, K/V for all keys in one matmul.
    # TODO(synk): for very large n the K/V projection is recomputed per query
    # tile; a separate projection pass / flash-style K-V streaming avoids it.
    q = jnp.dot(wqkv[0:d, :], x_q, preferred_element_type=F32) + bq    # (d, nq)
    kv = jnp.dot(wqkv[d:3 * d, :], x_all, preferred_element_type=F32)  # (2d, n)
    k = kv[0:d, :] + bk
    v = kv[d:2 * d, :] + bv
    heads = []
    for h in range(nhead):                                             # unrolled
        sl = slice(h * hd, (h + 1) * hd)
        qh = (q[sl, :] * scale).astype(BF16)                           # (hd, nq)
        kh = k[sl, :].astype(BF16)                                     # (hd, n)
        vh = v[sl, :].astype(BF16)                                     # (hd, n)
        s = lax.dot_general(qh, kh, (((0,), (0,)), ((), ())),
                            preferred_element_type=F32)                # (nq, n)
        s = s - jnp.max(s, axis=1, keepdims=True)
        p = jnp.exp(s)
        # exact reciprocal (keeps kernel/reference parity; no approx EUP rcp)
        p = p * (1.0 / jnp.sum(p, axis=1, keepdims=True))
        heads.append(lax.dot_general(vh, p.astype(BF16),
                                     (((1,), (1,)), ((), ())),
                                     preferred_element_type=F32))      # (hd, nq)
    o_cat = jnp.concatenate(heads, axis=0)        # (d, nq) sublane-axis concat
    attn = jnp.dot(wo, o_cat.astype(BF16), preferred_element_type=F32) + bo
    x1 = _layer_norm_cm(x_q.astype(F32) + attn, g1, be1)
    h1 = jnp.maximum(
        jnp.dot(w1f, x1.astype(BF16), preferred_element_type=F32) + b1f, 0.0)
    ff = jnp.dot(w2f, h1.astype(BF16), preferred_element_type=F32) + b2f
    return _layer_norm_cm(x1 + ff, g2, be2)


# ------------------------------- Pallas kernels -------------------------------
def _fp_mlp_kernel(uT_ref, k_ref, uf_ref, kfw0a_ref, w0b_ref, w1_ref, pka_ref,
                   out_ref, *, hidden, d_model):
    w_mat = _three_nn_weights(uT_ref[...], k_ref[...])          # (m, tile_n)
    s0 = pka_ref[0:hidden, 0:1]
    sh0 = pka_ref[0:hidden, 1:2]
    s1 = pka_ref[0:d_model, 2:3]
    sh1 = pka_ref[0:d_model, 3:4]
    y = _fp_mlp(w_mat, kfw0a_ref[...], uf_ref[...],
                w0b_ref[...], w1_ref[...], s0, sh0, s1, sh1)
    out_ref[...] = y.astype(out_ref.dtype)                      # (d, tile_n)


def _encoder_kernel(xq_ref, xall_ref, wqkv_ref, wo_ref, w1f_ref, w2f_ref,
                    pkb_ref, out_ref, *, nhead, d_model, dff):
    d = d_model
    bq = pkb_ref[0:d, 0:1]
    bk = pkb_ref[0:d, 1:2]
    bv = pkb_ref[0:d, 2:3]
    bo = pkb_ref[0:d, 3:4]
    g1 = pkb_ref[0:d, 4:5]
    be1 = pkb_ref[0:d, 5:6]
    b1f = pkb_ref[0:dff, 6:7]
    b2f = pkb_ref[0:d, 7:8]
    g2 = pkb_ref[0:d, 8:9]
    be2 = pkb_ref[0:d, 9:10]
    out_ref[...] = _encoder_layer(xq_ref[...], xall_ref[...],
                                  wqkv_ref[...], wo_ref[...],
                                  w1f_ref[...], w2f_ref[...],
                                  bq, bk, bv, bo, g1, be1, b1f, b2f, g2, be2,
                                  nhead=nhead)


# ------------------------------ param packing ---------------------------------
def _pack_params(params):
    hidden = params['w0a'].shape[0]
    d = params['w1'].shape[0]
    dff = params['w1f'].shape[0]
    pw_a = max(hidden, d)
    pw_b = max(d, dff)

    def col(v, w):
        v = v.reshape(-1).astype(F32)
        return jnp.pad(v, (0, w - v.shape[0]))

    pack_a = jnp.stack([col(params['s0'], pw_a), col(params['sh0'], pw_a),
                        col(params['s1'], pw_a), col(params['sh1'], pw_a)],
                       axis=1)                                   # (pw_a, 4)
    pack_b = jnp.stack([col(params['bq'], pw_b), col(params['bk'], pw_b),
                        col(params['bv'], pw_b), col(params['bo'], pw_b),
                        col(params['g1'], pw_b), col(params['be1'], pw_b),
                        col(params['b1f'], pw_b), col(params['b2f'], pw_b),
                        col(params['g2'], pw_b), col(params['be2'], pw_b)],
                       axis=1)                                   # (pw_b, 10)
    return dict(
        w0b=params['w0b'].astype(BF16),      # (hidden, C1)
        w1=params['w1'].astype(BF16),        # (d_model, hidden)
        wqkv=params['wqkv'].astype(BF16),    # (3*d_model, d_model)
        wo=params['wo'].astype(BF16),        # (d_model, d_model)
        w1f=params['w1f'].astype(BF16),      # (dff, d_model)
        w2f=params['w2f'].astype(BF16),      # (d_model, dff)
        pack_a=pack_a.astype(F32),
        pack_b=pack_b.astype(F32),
    )


# ------------------------------- tile selection --------------------------------
def _pick_tile_n(n, m):
    # Biggest point tile dividing n whose (m, tile) f32 3-NN work buffers stay
    # well inside a 32 MiB (v7x-safe) VMEM budget.
    for t in (512, 256, 128):
        if n % t == 0 and 6 * m * t * 4 <= (24 << 20):
            return t
    # TODO(synk): pad n up to a multiple of 128 instead of this full-n fallback
    # when n is large and not 128-aligned.
    return n


def _pick_tile_q(n):
    # Query tile for the encoder: bounds the per-head (tile_q, n) f32 score /
    # prob matrices and gives v7x's two TensorCores a second parallel axis.
    for t in (256, 128):
        if n % t == 0 and 3 * n * t * 4 <= (24 << 20):
            return t
    # TODO(synk): flash-style K/V streaming when (tile_q, n) scores get too big.
    return n


# ---------------------------------- wrapper ------------------------------------
@functools.partial(jax.jit, static_argnames=('nhead',))
def pointnet_fp_forward(unknown, known, unknow_feats, known_feats, params,
                        nhead=4):
    """unknown (B,n,3), known (B,m,3), unknow_feats (B,C1,n), known_feats
    (B,C2,m) -> (B, d_model, n) (same contract as the PyTorch module)."""
    B, n, _ = unknown.shape
    m = known.shape[1]
    C1 = unknow_feats.shape[1]
    assert m >= 3, "three_nn requires at least 3 known points"

    ops = _pack_params(params)
    hidden = params['w0a'].shape[0]
    d_model = params['w1'].shape[0]
    dff = params['w1f'].shape[0]

    tile_n = _pick_tile_n(n, m)
    nt = n // tile_n
    tile_q = _pick_tile_q(n)
    ntq = n // tile_q

    uT = jnp.transpose(unknown, (0, 2, 1)).astype(F32)          # (B, 3, n) tiny
    kxyz = known.astype(F32)                                    # (B, m, 3) tiny
    uf = unknow_feats.astype(BF16)                              # (B, C1, n)
    # Algebraic fusion of three_interpolate with the first 1x1 conv branch:
    # kfw0a[b] = w0a @ known_feats[b]   (f32 accumulate, stored bf16).
    kfw0a = jnp.einsum('hc,bcm->bhm', params['w0a'].astype(F32),
                       known_feats.astype(F32)).astype(BF16)    # (B, hid, m)

    def const(a):
        nd = a.ndim
        return pl.BlockSpec(a.shape, lambda b, i, _nd=nd: (0,) * _nd)

    # 1/2 of v7x's 64 MiB per-TC VMEM (leaves compiler headroom); plenty on
    # v5e/v6e.  Tiles above are sized to fit comfortably inside this cap.
    vmem_cap = 32 * 1024 * 1024

    # -------- kernel A: three_nn + fused three_interpolate + shared MLP ------
    flops_a = int(B * (25 * n * m + 2 * n * m * hidden
                       + 2 * n * C1 * hidden + 2 * n * hidden * d_model))
    bytes_a = int(uT.size * 4 + kxyz.size * 4 + uf.size * 2 + kfw0a.size * 2
                  + ops['w0b'].size * 2 + ops['w1'].size * 2
                  + ops['pack_a'].size * 4 + B * n * d_model * 2)
    x = pl.pallas_call(
        functools.partial(_fp_mlp_kernel, hidden=hidden, d_model=d_model),
        out_shape=jax.ShapeDtypeStruct((B, d_model, n), BF16),
        grid=(B, nt),
        in_specs=[
            pl.BlockSpec((None, 3, tile_n), lambda b, i: (b, 0, i)),
            pl.BlockSpec((None, m, 3), lambda b, i: (b, 0, 0)),
            pl.BlockSpec((None, C1, tile_n), lambda b, i: (b, 0, i)),
            pl.BlockSpec((None, hidden, m), lambda b, i: (b, 0, 0)),
            const(ops['w0b']), const(ops['w1']), const(ops['pack_a']),
        ],
        out_specs=pl.BlockSpec((None, d_model, tile_n), lambda b, i: (b, 0, i)),
        compiler_params=pltpu.CompilerParams(
            dimension_semantics=("parallel", "parallel"),
            vmem_limit_bytes=vmem_cap),
        cost_estimate=pl.CostEstimate(flops=flops_a,
                                      transcendentals=int(3 * B * n),
                                      bytes_accessed=bytes_a),
    )(uT, kxyz, uf, kfw0a, ops['w0b'], ops['w1'], ops['pack_a'])

    # -------- kernel B: 1-layer post-norm transformer encoder (Q-tiled) ------
    flops_b = int(B * (2 * n * d_model * d_model * (2 + 2 * ntq)
                       + 4 * n * n * d_model + 4 * n * d_model * dff
                       + 12 * n * d_model))
    bytes_b = int(B * n * d_model * 2 * (1 + ntq)
                  + ops['wqkv'].size * 2 + ops['wo'].size * 2
                  + ops['w1f'].size * 2 + ops['w2f'].size * 2
                  + ops['pack_b'].size * 4 + B * n * d_model * 4)
    out = pl.pallas_call(
        functools.partial(_encoder_kernel, nhead=nhead, d_model=d_model,
                          dff=dff),
        out_shape=jax.ShapeDtypeStruct((B, d_model, n), F32),
        grid=(B, ntq),
        in_specs=[
            pl.BlockSpec((None, d_model, tile_q), lambda b, qi: (b, 0, qi)),
            pl.BlockSpec((None, d_model, n), lambda b, qi: (b, 0, 0)),
            const(ops['wqkv']), const(ops['wo']),
            const(ops['w1f']), const(ops['w2f']), const(ops['pack_b']),
        ],
        out_specs=pl.BlockSpec((None, d_model, tile_q),
                               lambda b, qi: (b, 0, qi)),
        compiler_params=pltpu.CompilerParams(
            dimension_semantics=("parallel", "parallel"),
            vmem_limit_bytes=vmem_cap),
        cost_estimate=pl.CostEstimate(flops=flops_b,
                                      transcendentals=int(B * nhead * n * n),
                                      bytes_accessed=bytes_b),
    )(x, x, ops['wqkv'], ops['wo'], ops['w1f'], ops['w2f'], ops['pack_b'])
    return out


# --------------------------- plain-JAX reference -------------------------------
def reference_forward(unknown, known, unknow_feats, known_feats, params,
                      nhead=4):
    """Mirror of the kernels (same math / mixed-precision policy) in plain JAX."""
    ops = _pack_params(params)
    hidden = params['w0a'].shape[0]
    d = params['w1'].shape[0]
    dff = params['w1f'].shape[0]

    uT = jnp.transpose(unknown, (0, 2, 1)).astype(F32)
    kxyz = known.astype(F32)
    uf = unknow_feats.astype(BF16)
    kfw0a = jnp.einsum('hc,bcm->bhm', params['w0a'].astype(F32),
                       known_feats.astype(F32)).astype(BF16)
    pa, pb = ops['pack_a'], ops['pack_b']

    def one(uT_b, k_b, uf_b, kfw0a_b):
        w_mat = _three_nn_weights(uT_b, k_b)
        xf = _fp_mlp(w_mat, kfw0a_b, uf_b, ops['w0b'], ops['w1'],
                     pa[0:hidden, 0:1], pa[0:hidden, 1:2],
                     pa[0:d, 2:3], pa[0:d, 3:4])
        xb = xf.astype(BF16)   # mirrors the bf16 kernel-A -> kernel-B hop
        return _encoder_layer(xb, xb, ops['wqkv'], ops['wo'], ops['w1f'],
                              ops['w2f'],
                              pb[0:d, 0:1], pb[0:d, 1:2], pb[0:d, 2:3],
                              pb[0:d, 3:4], pb[0:d, 4:5], pb[0:d, 5:6],
                              pb[0:dff, 6:7], pb[0:d, 7:8],
                              pb[0:d, 8:9], pb[0:d, 9:10], nhead=nhead)

    return jax.vmap(one)(uT, kxyz, uf, kfw0a)


# ------------------------------------ main --------------------------------------
def _make_params(key, C1, C2, hidden, d_model, nhead):
    dff = d_model  # dim_feedforward == mlp[-1] in the module
    keys = iter(jax.random.split(key, 32))

    def nrm(shape, s=0.1):
        return (s * jax.random.normal(next(keys), shape)).astype(F32)

    return {
        # shared MLP: mlp = [C2 + C1, hidden, d_model]; BN folded (eval mode)
        'w0a': nrm((hidden, C2)), 'w0b': nrm((hidden, C1)),
        's0': 1.0 + nrm((hidden,), 0.05), 'sh0': nrm((hidden,)),
        'w1': nrm((d_model, hidden)),
        's1': 1.0 + nrm((d_model,), 0.05), 'sh1': nrm((d_model,)),
        # MultiheadAttention: fused in_proj (3d, d) + biases, out_proj
        'wqkv': nrm((3 * d_model, d_model)),
        'bq': nrm((d_model,)), 'bk': nrm((d_model,)), 'bv': nrm((d_model,)),
        'wo': nrm((d_model, d_model)), 'bo': nrm((d_model,)),
        'g1': 1.0 + nrm((d_model,), 0.05), 'be1': nrm((d_model,)),
        'w1f': nrm((dff, d_model)), 'b1f': nrm((dff,)),
        'w2f': nrm((d_model, dff)), 'b2f': nrm((d_model,)),
        'g2': 1.0 + nrm((d_model,), 0.05), 'be2': nrm((d_model,)),
    }


if __name__ == "__main__":
    B, n, m = 2, 16, 8
    C1, C2 = 4, 6                       # unknow_feats / known_feats channels
    hidden, d_model, nhead = 32, 32, 4  # mlp = [C1 + C2, 32, 32]

    key = jax.random.PRNGKey(0)
    k0, k1, k2, k3, kp = jax.random.split(key, 5)
    unknown = jax.random.normal(k0, (B, n, 3), dtype=F32)
    known = jax.random.normal(k1, (B, m, 3), dtype=F32)
    unknow_feats = jax.random.normal(k2, (B, C1, n), dtype=F32)
    known_feats = jax.random.normal(k3, (B, C2, m), dtype=F32)
    params = _make_params(kp, C1, C2, hidden, d_model, nhead)

    out = pointnet_fp_forward(unknown, known, unknow_feats, known_feats,
                              params, nhead=nhead)
    out = jax.block_until_ready(out)

    ref = reference_forward(unknown, known, unknow_feats, known_feats,
                            params, nhead=nhead)
    assert out.shape == (B, d_model, n), out.shape
    err = float(jnp.max(jnp.abs(out - ref)))
    # bf16 matmuls + platform transcendental differences set the error scale;
    # all math (including exact softmax reciprocal) is shared with the ref.
    assert jnp.allclose(out, ref, atol=5e-3, rtol=5e-3), err
    print("KERNEL_OK")
</pallas_src>

<mosaic_0001>
module attributes {stable_mosaic.version = 11 : i64} {
  func.func @_fp_mlp_kernel(%arg0: i32, %arg1: i32, %arg2: memref<1x3x16xf32, #tpu.memory_space<vmem>>, %arg3: memref<1x8x3xf32, #tpu.memory_space<vmem>>, %arg4: memref<1x4x16xbf16, #tpu.memory_space<vmem>>, %arg5: memref<1x32x8xbf16, #tpu.memory_space<vmem>>, %arg6: memref<32x4xbf16, #tpu.memory_space<vmem>>, %arg7: memref<32x32xbf16, #tpu.memory_space<vmem>>, %arg8: memref<32x4xf32, #tpu.memory_space<vmem>>, %arg9: memref<1x32x16xbf16, #tpu.memory_space<vmem>>) attributes {dimension_semantics = [#tpu.dimension_semantics<parallel>, #tpu.dimension_semantics<parallel>], iteration_bounds = array<i64: 2, 1>, scalar_prefetch = 0 : i64, scratch_operands = 0 : i64, tpu.core_type = #tpu.core_type<tc>, window_params = [{transform_indices = @transform_0, window_bounds = array<i64: 1, 3, 16>}, {transform_indices = @transform_1, window_bounds = array<i64: 1, 8, 3>}, {transform_indices = @transform_2, window_bounds = array<i64: 1, 4, 16>}, {transform_indices = @transform_3, window_bounds = array<i64: 1, 32, 8>}, {pipeline_mode = #tpu.pipeline_mode<synchronous>, transform_indices = @transform_4, window_bounds = array<i64: 32, 4>}, {pipeline_mode = #tpu.pipeline_mode<synchronous>, transform_indices = @transform_5, window_bounds = array<i64: 32, 32>}, {pipeline_mode = #tpu.pipeline_mode<synchronous>, transform_indices = @transform_6, window_bounds = array<i64: 32, 4>}, {transform_indices = @transform_7, window_bounds = array<i64: 1, 32, 16>}]} {
    %c0 = arith.constant 0 : index
    %c0_0 = arith.constant 0 : index
    %c0_1 = arith.constant 0 : index
    %0 = vector.load %arg2[%c0, %c0_0, %c0_1] : memref<1x3x16xf32, #tpu.memory_space<vmem>>, vector<1x3x16xf32>
    %1 = vector.shape_cast %0 : vector<1x3x16xf32> to vector<3x16xf32>
    %c0_2 = arith.constant 0 : index
    %c0_3 = arith.constant 0 : index
    %c0_4 = arith.constant 0 : index
    %2 = vector.load %arg3[%c0_2, %c0_3, %c0_4] : memref<1x8x3xf32, #tpu.memory_space<vmem>>, vector<1x8x3xf32>
    %3 = vector.shape_cast %2 : vector<1x8x3xf32> to vector<8x3xf32>
    %4 = vector.extract_strided_slice %3 {offsets = [0, 0], sizes = [8, 1], strides = [1, 1]} : vector<8x3xf32> to vector<8x1xf32>
    %5 = vector.extract_strided_slice %1 {offsets = [0, 0], sizes = [1, 16], strides = [1, 1]} : vector<3x16xf32> to vector<1x16xf32>
    %6 = vector.broadcast %4 : vector<8x1xf32> to vector<8x16xf32>
    %7 = vector.broadcast %5 : vector<1x16xf32> to vector<8x16xf32>
    %8 = arith.subf %6, %7 : vector<8x16xf32>
    %9 = arith.mulf %8, %8 : vector<8x16xf32>
    %10 = vector.extract_strided_slice %3 {offsets = [0, 1], sizes = [8, 1], strides = [1, 1]} : vector<8x3xf32> to vector<8x1xf32>
    %11 = vector.extract_strided_slice %1 {offsets = [1, 0], sizes = [1, 16], strides = [1, 1]} : vector<3x16xf32> to vector<1x16xf32>
    %12 = vector.broadcast %10 : vector<8x1xf32> to vector<8x16xf32>
    %13 = vector.broadcast %11 : vector<1x16xf32> to vector<8x16xf32>
    %14 = arith.subf %12, %13 : vector<8x16xf32>
    %15 = arith.mulf %14, %14 : vector<8x16xf32>
    %16 = arith.addf %9, %15 : vector<8x16xf32>
    %17 = vector.extract_strided_slice %3 {offsets = [0, 2], sizes = [8, 1], strides = [1, 1]} : vector<8x3xf32> to vector<8x1xf32>
    %18 = vector.extract_strided_slice %1 {offsets = [2, 0], sizes = [1, 16], strides = [1, 1]} : vector<3x16xf32> to vector<1x16xf32>
    %19 = vector.broadcast %17 : vector<8x1xf32> to vector<8x16xf32>
    %20 = vector.broadcast %18 : vector<1x16xf32> to vector<8x16xf32>
    %21 = arith.subf %19, %20 : vector<8x16xf32>
    %22 = arith.mulf %21, %21 : vector<8x16xf32>
    %23 = arith.addf %16, %22 : vector<8x16xf32>
    %24 = tpu.iota {dimensions = array<i32: 0>} : vector<8x16xi32>
    %cst = arith.constant 0.000000e+00 : f32
    %25 = vector.broadcast %cst : f32 to vector<8x16xf32>
    %cst_5 = arith.constant 0.000000e+00 : f32
    %26 = vector.broadcast %cst_5 : f32 to vector<1x16xf32>
    %cst_6 = arith.constant dense<0x7F800000> : vector<16xf32>
    %27 = vector.multi_reduction <minimumf>, %23, %cst_6 [0] : vector<8x16xf32> to vector<16xf32>
    %28 = vector.shape_cast %27 : vector<16xf32> to vector<1x16xf32>
    %29 = vector.broadcast %28 : vector<1x16xf32> to vector<8x16xf32>
    %30 = arith.cmpf oeq, %23, %29 : vector<8x16xf32>
    %c8_i32 = arith.constant 8 : i32
    %31 = vector.broadcast %c8_i32 : i32 to vector<8x16xi32>
    %32 = arith.select %30, %24, %31 : vector<8x16xi1>, vector<8x16xi32>
    %cst_7 = arith.constant dense<2147483647> : vector<16xi32>
    %33 = vector.multi_reduction <minsi>, %32, %cst_7 [0] : vector<8x16xi32> to vector<16xi32>
    %34 = vector.shape_cast %33 : vector<16xi32> to vector<1x16xi32>
    %35 = vector.broadcast %34 : vector<1x16xi32> to vector<8x16xi32>
    %36 = arith.cmpi eq, %24, %35 : vector<8x16xi32>
    %cst_8 = arith.constant 0.000000e+00 : f32
    %37 = vector.broadcast %cst_8 : f32 to vector<1x16xf32>
    %38 = arith.maximumf %28, %37 : vector<1x16xf32>
    %39 = math.sqrt %38 : vector<1x16xf32>
    %cst_9 = arith.constant 9.99999993E-9 : f32
    %40 = vector.broadcast %cst_9 : f32 to vector<1x16xf32>
    %41 = arith.addf %39, %40 : vector<1x16xf32>
    %cst_10 = arith.constant 1.000000e+00 : f32
    %42 = vector.broadcast %cst_10 : f32 to vector<1x16xf32>
    %43 = arith.divf %42, %41 : vector<1x16xf32>
    %cst_11 = arith.constant 0.000000e+00 : f32
    %44 = vector.shape_cast %43 : vector<1x16xf32> to vector<1x16xf32>
    %45 = vector.broadcast %44 : vector<1x16xf32> to vector<8x16xf32>
    %46 = vector.broadcast %cst_11 : f32 to vector<8x16xf32>
    %47 = arith.select %36, %45, %46 : vector<8x16xi1>, vector<8x16xf32>
    %48 = arith.addf %25, %47 : vector<8x16xf32>
    %49 = arith.addf %26, %43 : vector<1x16xf32>
    %cst_12 = arith.constant 0x7F800000 : f32
    %50 = vector.broadcast %cst_12 : f32 to vector<8x16xf32>
    %51 = arith.select %36, %50, %23 : vector<8x16xi1>, vector<8x16xf32>
    %cst_13 = arith.constant dense<0x7F800000> : vector<16xf32>
    %52 = vector.multi_reduction <minimumf>, %51, %cst_13 [0] : vector<8x16xf32> to vector<16xf32>
    %53 = vector.shape_cast %52 : vector<16xf32> to vector<1x16xf32>
    %54 = vector.broadcast %53 : vector<1x16xf32> to vector<8x16xf32>
    %55 = arith.cmpf oeq, %51, %54 : vector<8x16xf32>
    %c8_i32_14 = arith.constant 8 : i32
    %56 = vector.broadcast %c8_i32_14 : i32 to vector<8x16xi32>
    %57 = arith.select %55, %24, %56 : vector<8x16xi1>, vector<8x16xi32>
    %cst_15 = arith.constant dense<2147483647> : vector<16xi32>
    %58 = vector.multi_reduction <minsi>, %57, %cst_15 [0] : vector<8x16xi32> to vector<16xi32>
    %59 = vector.shape_cast %58 : vector<16xi32> to vector<1x16xi32>
    %60 = vector.broadcast %59 : vector<1x16xi32> to vector<8x16xi32>
    %61 = arith.cmpi eq, %24, %60 : vector<8x16xi32>
    %cst_16 = arith.constant 0.000000e+00 : f32
    %62 = vector.broadcast %cst_16 : f32 to vector<1x16xf32>
    %63 = arith.maximumf %53, %62 : vector<1x16xf32>
    %64 = math.sqrt %63 : vector<1x16xf32>
    %cst_17 = arith.constant 9.99999993E-9 : f32
    %65 = vector.broadcast %cst_17 : f32 to vector<1x16xf32>
    %66 = arith.addf %64, %65 : vector<1x16xf32>
    %cst_18 = arith.constant 1.000000e+00 : f32
    %67 = vector.broadcast %cst_18 : f32 to vector<1x16xf32>
    %68 = arith.divf %67, %66 : vector<1x16xf32>
    %cst_19 = arith.constant 0.000000e+00 : f32
    %69 = vector.shape_cast %68 : vector<1x16xf32> to vector<1x16xf32>
    %70 = vector.broadcast %69 : vector<1x16xf32> to vector<8x16xf32>
    %71 = vector.broadcast %cst_19 : f32 to vector<8x16xf32>
    %72 = arith.select %61, %70, %71 : vector<8x16xi1>, vector<8x16xf32>
    %73 = arith.addf %48, %72 : vector<8x16xf32>
    %74 = arith.addf %49, %68 : vector<1x16xf32>
    %cst_20 = arith.constant 0x7F800000 : f32
    %75 = vector.broadcast %cst_20 : f32 to vector<8x16xf32>
    %76 = arith.select %61, %75, %51 : vector<8x16xi1>, vector<8x16xf32>
    %cst_21 = arith.constant dense<0x7F800000> : vector<16xf32>
    %77 = vector.multi_reduction <minimumf>, %76, %cst_21 [0] : vector<8x16xf32> to vector<16xf32>
    %78 = vector.shape_cast %77 : vector<16xf32> to vector<1x16xf32>
    %79 = vector.broadcast %78 : vector<1x16xf32> to vector<8x16xf32>
    %80 = arith.cmpf oeq, %76, %79 : vector<8x16xf32>
    %c8_i32_22 = arith.constant 8 : i32
    %81 = vector.broadcast %c8_i32_22 : i32 to vector<8x16xi32>
    %82 = arith.select %80, %24, %81 : vector<8x16xi1>, vector<8x16xi32>
    %cst_23 = arith.constant dense<2147483647> : vector<16xi32>
    %83 = vector.multi_reduction <minsi>, %82, %cst_23 [0] : vector<8x16xi32> to vector<16xi32>
    %84 = vector.shape_cast %83 : vector<16xi32> to vector<1x16xi32>
    %85 = vector.broadcast %84 : vector<1x16xi32> to vector<8x16xi32>
    %86 = arith.cmpi eq, %24, %85 : vector<8x16xi32>
    %cst_24 = arith.constant 0.000000e+00 : f32
    %87 = vector.broadcast %cst_24 : f32 to vector<1x16xf32>
    %88 = arith.maximumf %78, %87 : vector<1x16xf32>
    %89 = math.sqrt %88 : vector<1x16xf32>
    %cst_25 = arith.constant 9.99999993E-9 : f32
    %90 = vector.broadcast %cst_25 : f32 to vector<1x16xf32>
    %91 = arith.addf %89, %90 : vector<1x16xf32>
    %cst_26 = arith.constant 1.000000e+00 : f32
    %92 = vector.broadcast %cst_26 : f32 to vector<1x16xf32>
    %93 = arith.divf %92, %91 : vector<1x16xf32>
    %cst_27 = arith.constant 0.000000e+00 : f32
    %94 = vector.shape_cast %93 : vector<1x16xf32> to vector<1x16xf32>
    %95 = vector.broadcast %94 : vector<1x16xf32> to vector<8x16xf32>
    %96 = vector.broadcast %cst_27 : f32 to vector<8x16xf32>
    %97 = arith.select %86, %95, %96 : vector<8x16xi1>, vector<8x16xf32>
    %98 = arith.addf %73, %97 : vector<8x16xf32>
    %99 = arith.addf %74, %93 : vector<1x16xf32>
    %cst_28 = arith.constant 1.000000e+00 : f32
    %100 = vector.broadcast %cst_28 : f32 to vector<1x16xf32>
    %101 = arith.divf %100, %99 : vector<1x16xf32>
    %102 = vector.broadcast %101 : vector<1x16xf32> to vector<8x16xf32>
    %103 = arith.mulf %98, %102 : vector<8x16xf32>
    %c0_29 = arith.constant 0 : index
    %c0_30 = arith.constant 0 : index
    %104 = vector.load %arg8[%c0_29, %c0_30] : memref<32x4xf32, #tpu.memory_space<vmem>>, vector<32x1xf32>
    %c0_31 = arith.constant 0 : index
    %c1 = arith.constant 1 : index
    %105 = vector.load %arg8[%c0_31, %c1] : memref<32x4xf32, #tpu.memory_space<vmem>>, vector<32x1xf32>
    %c0_32 = arith.constant 0 : index
    %c2 = arith.constant 2 : index
    %106 = vector.load %arg8[%c0_32, %c2] : memref<32x4xf32, #tpu.memory_space<vmem>>, vector<32x1xf32>
    %c0_33 = arith.constant 0 : index
    %c3 = arith.constant 3 : index
    %107 = vector.load %arg8[%c0_33, %c3] : memref<32x4xf32, #tpu.memory_space<vmem>>, vector<32x1xf32>
    %c0_34 = arith.constant 0 : index
    %c0_35 = arith.constant 0 : index
    %c0_36 = arith.constant 0 : index
    %108 = vector.load %arg5[%c0_34, %c0_35, %c0_36] : memref<1x32x8xbf16, #tpu.memory_space<vmem>>, vector<1x32x8xbf16>
    %109 = vector.shape_cast %108 : vector<1x32x8xbf16> to vector<32x8xbf16>
    %c0_37 = arith.constant 0 : index
    %c0_38 = arith.constant 0 : index
    %c0_39 = arith.constant 0 : index
    %110 = vector.load %arg4[%c0_37, %c0_38, %c0_39] : memref<1x4x16xbf16, #tpu.memory_space<vmem>>, vector<1x4x16xbf16>
    %111 = vector.shape_cast %110 : vector<1x4x16xbf16> to vector<4x16xbf16>
    %c0_40 = arith.constant 0 : index
    %c0_41 = arith.constant 0 : index
    %112 = vector.load %arg6[%c0_40, %c0_41] : memref<32x4xbf16, #tpu.memory_space<vmem>>, vector<32x4xbf16>
    %c0_42 = arith.constant 0 : index
    %c0_43 = arith.constant 0 : index
    %113 = vector.load %arg7[%c0_42, %c0_43] : memref<32x32xbf16, #tpu.memory_space<vmem>>, vector<32x32xbf16>
    %114 = arith.truncf %103 : vector<8x16xf32> to vector<8x16xbf16>
    %cst_44 = arith.constant dense<0.000000e+00> : vector<32x16xf32>
    %115 = tpu.matmul %109, %114, %cst_44 {dimension_numbers = #tpu.dot_dimension_numbers<[1], [0], [0], [1], [0, 0, 1, 1], [], []>} : vector<32x8xbf16>, vector<8x16xbf16>, vector<32x16xf32> -> vector<32x16xf32>
    %cst_45 = arith.constant dense<0.000000e+00> : vector<32x16xf32>
    %116 = tpu.matmul %112, %111, %cst_45 {dimension_numbers = #tpu.dot_dimension_numbers<[1], [0], [0], [1], [0, 0, 1, 1], [], []>} : vector<32x4xbf16>, vector<4x16xbf16>, vector<32x16xf32> -> vector<32x16xf32>
    %117 = arith.addf %115, %116 : vector<32x16xf32>
    %118 = vector.broadcast %104 : vector<32x1xf32> to vector<32x16xf32>
    %119 = arith.mulf %117, %118 : vector<32x16xf32>
    %120 = vector.broadcast %105 : vector<32x1xf32> to vector<32x16xf32>
    %121 = arith.addf %119, %120 : vector<32x16xf32>
    %cst_46 = arith.constant 0.000000e+00 : f32
    %122 = vector.broadcast %cst_46 : f32 to vector<32x16xf32>
    %123 = arith.maximumf %121, %122 : vector<32x16xf32>
    %124 = arith.truncf %123 : vector<32x16xf32> to vector<32x16xbf16>
    %cst_47 = arith.constant dense<0.000000e+00> : vector<32x16xf32>
    %125 = tpu.matmul %113, %124, %cst_47 {dimension_numbers = #tpu.dot_dimension_numbers<[1], [0], [0], [1], [0, 0, 1, 1], [], []>} : vector<32x32xbf16>, vector<32x16xbf16>, vector<32x16xf32> -> vector<32x16xf32>
    %126 = vector.broadcast %106 : vector<32x1xf32> to vector<32x16xf32>
    %127 = arith.mulf %125, %126 : vector<32x16xf32>
    %128 = vector.broadcast %107 : vector<32x1xf32> to vector<32x16xf32>
    %129 = arith.addf %127, %128 : vector<32x16xf32>
    %cst_48 = arith.constant 0.000000e+00 : f32
    %130 = vector.broadcast %cst_48 : f32 to vector<32x16xf32>
    %131 = arith.maximumf %129, %130 : vector<32x16xf32>
    %132 = arith.truncf %131 : vector<32x16xf32> to vector<32x16xbf16>
    %c0_49 = arith.constant 0 : index
    %c0_50 = arith.constant 0 : index
    %c0_51 = arith.constant 0 : index
    %133 = vector.load %arg9[%c0_49, %c0_50, %c0_51] : memref<1x32x16xbf16, #tpu.memory_space<vmem>>, vector<1x32x16xbf16>
    %134 = vector.shape_cast %133 : vector<1x32x16xbf16> to vector<32x16xbf16>
    %135 = vector.shape_cast %132 : vector<32x16xbf16> to vector<1x32x16xbf16>
    tpu.vector_store %arg9[%c0_49, %c0_50, %c0_51], %135 {strides = array<i32>} : memref<1x32x16xbf16, #tpu.memory_space<vmem>>, vector<1x32x16xbf16>,
    return
  }
  func.func @transform_0(%arg0: i32, %arg1: i32) -> (i32, i32, i32) {
    %c0_i32 = arith.constant 0 : i32
    %c0_i32_0 = arith.constant 0 : i32
    return %arg0, %c0_i32, %arg1 : i32, i32, i32
  }
  func.func @transform_1(%arg0: i32, %arg1: i32) -> (i32, i32, i32) {
    %c0_i32 = arith.constant 0 : i32
    %c0_i32_0 = arith.constant 0 : i32
    %c0_i32_1 = arith.constant 0 : i32
    return %arg0, %c0_i32, %c0_i32_0 : i32, i32, i32
  }
  func.func @transform_2(%arg0: i32, %arg1: i32) -> (i32, i32, i32) {
    %c0_i32 = arith.constant 0 : i32
    %c0_i32_0 = arith.constant 0 : i32
    return %arg0, %c0_i32, %arg1 : i32, i32, i32
  }
  func.func @transform_3(%arg0: i32, %arg1: i32) -> (i32, i32, i32) {
    %c0_i32 = arith.constant 0 : i32
    %c0_i32_0 = arith.constant 0 : i32
    %c0_i32_1 = arith.constant 0 : i32
    return %arg0, %c0_i32, %c0_i32_0 : i32, i32, i32
  }
  func.func @transform_4(%arg0: i32, %arg1: i32) -> (i32, i32) {
    %c0_i32 = arith.constant 0 : i32
    %c0_i32_0 = arith.constant 0 : i32
    %c0_i32_1 = arith.constant 0 : i32
    return %c0_i32, %c0_i32_0 : i32, i32
  }
  func.func @transform_5(%arg0: i32, %arg1: i32) -> (i32, i32) {
    %c0_i32 = arith.constant 0 : i32
    %c0_i32_0 = arith.constant 0 : i32
    %c0_i32_1 = arith.constant 0 : i32
    return %c0_i32, %c0_i32_0 : i32, i32
  }
  func.func @transform_6(%arg0: i32, %arg1: i32) -> (i32, i32) {
    %c0_i32 = arith.constant 0 : i32
    %c0_i32_0 = arith.constant 0 : i32
    %c0_i32_1 = arith.constant 0 : i32
    return %c0_i32, %c0_i32_0 : i32, i32
  }
  func.func @transform_7(%arg0: i32, %arg1: i32) -> (i32, i32, i32) {
    %c0_i32 = arith.constant 0 : i32
    %c0_i32_0 = arith.constant 0 : i32
    return %arg0, %c0_i32, %arg1 : i32, i32, i32
  }
}

module attributes {stable_mosaic.version = 11 : i64} {
  func.func @_encoder_kernel(%arg0: i32, %arg1: i32, %arg2: memref<1x32x16xbf16, #tpu.memory_space<vmem>>, %arg3: memref<1x32x16xbf16, #tpu.memory_space<vmem>>, %arg4: memref<96x32xbf16, #tpu.memory_space<vmem>>, %arg5: memref<32x32xbf16, #tpu.memory_space<vmem>>, %arg6: memref<32x32xbf16, #tpu.memory_space<vmem>>, %arg7: memref<32x32xbf16, #tpu.memory_space<vmem>>, %arg8: memref<32x10xf32, #tpu.memory_space<vmem>>, %arg9: memref<1x32x16xf32, #tpu.memory_space<vmem>>) attributes {dimension_semantics = [#tpu.dimension_semantics<parallel>, #tpu.dimension_semantics<parallel>], iteration_bounds = array<i64: 2, 1>, scalar_prefetch = 0 : i64, scratch_operands = 0 : i64, tpu.core_type = #tpu.core_type<tc>, window_params = [{transform_indices = @transform_0, window_bounds = array<i64: 1, 32, 16>}, {transform_indices = @transform_1, window_bounds = array<i64: 1, 32, 16>}, {pipeline_mode = #tpu.pipeline_mode<synchronous>, transform_indices = @transform_2, window_bounds = array<i64: 96, 32>}, {pipeline_mode = #tpu.pipeline_mode<synchronous>, transform_indices = @transform_3, window_bounds = array<i64: 32, 32>}, {pipeline_mode = #tpu.pipeline_mode<synchronous>, transform_indices = @transform_4, window_bounds = array<i64: 32, 32>}, {pipeline_mode = #tpu.pipeline_mode<synchronous>, transform_indices = @transform_5, window_bounds = array<i64: 32, 32>}, {pipeline_mode = #tpu.pipeline_mode<synchronous>, transform_indices = @transform_6, window_bounds = array<i64: 32, 10>}, {transform_indices = @transform_7, window_bounds = array<i64: 1, 32, 16>}]} {
    %c0 = arith.constant 0 : index
    %c0_0 = arith.constant 0 : index
    %0 = vector.load %arg8[%c0, %c0_0] : memref<32x10xf32, #tpu.memory_space<vmem>>, vector<32x1xf32>
    %c0_1 = arith.constant 0 : index
    %c1 = arith.constant 1 : index
    %1 = vector.load %arg8[%c0_1, %c1] : memref<32x10xf32, #tpu.memory_space<vmem>>, vector<32x1xf32>
    %c0_2 = arith.constant 0 : index
    %c2 = arith.constant 2 : index
    %2 = vector.load %arg8[%c0_2, %c2] : memref<32x10xf32, #tpu.memory_space<vmem>>, vector<32x1xf32>
    %c0_3 = arith.constant 0 : index
    %c3 = arith.constant 3 : index
    %3 = vector.load %arg8[%c0_3, %c3] : memref<32x10xf32, #tpu.memory_space<vmem>>, vector<32x1xf32>
    %c0_4 = arith.constant 0 : index
    %c4 = arith.constant 4 : index
    %4 = vector.load %arg8[%c0_4, %c4] : memref<32x10xf32, #tpu.memory_space<vmem>>, vector<32x1xf32>
    %c0_5 = arith.constant 0 : index
    %c5 = arith.constant 5 : index
    %5 = vector.load %arg8[%c0_5, %c5] : memref<32x10xf32, #tpu.memory_space<vmem>>, vector<32x1xf32>
    %c0_6 = arith.constant 0 : index
    %c6 = arith.constant 6 : index
    %6 = vector.load %arg8[%c0_6, %c6] : memref<32x10xf32, #tpu.memory_space<vmem>>, vector<32x1xf32>
    %c0_7 = arith.constant 0 : index
    %c7 = arith.constant 7 : index
    %7 = vector.load %arg8[%c0_7, %c7] : memref<32x10xf32, #tpu.memory_space<vmem>>, vector<32x1xf32>
    %c0_8 = arith.constant 0 : index
    %c8 = arith.constant 8 : index
    %8 = vector.load %arg8[%c0_8, %c8] : memref<32x10xf32, #tpu.memory_space<vmem>>, vector<32x1xf32>
    %c0_9 = arith.constant 0 : index
    %c9 = arith.constant 9 : index
    %9 = vector.load %arg8[%c0_9, %c9] : memref<32x10xf32, #tpu.memory_space<vmem>>, vector<32x1xf32>
    %c0_10 = arith.constant 0 : index
    %c0_11 = arith.constant 0 : index
    %c0_12 = arith.constant 0 : index
    %10 = vector.load %arg2[%c0_10, %c0_11, %c0_12] : memref<1x32x16xbf16, #tpu.memory_space<vmem>>, vector<1x32x16xbf16>
    %11 = vector.shape_cast %10 : vector<1x32x16xbf16> to vector<32x16xbf16>
    %c0_13 = arith.constant 0 : index
    %c0_14 = arith.constant 0 : index
    %c0_15 = arith.constant 0 : index
    %12 = vector.load %arg3[%c0_13, %c0_14, %c0_15] : memref<1x32x16xbf16, #tpu.memory_space<vmem>>, vector<1x32x16xbf16>
    %13 = vector.shape_cast %12 : vector<1x32x16xbf16> to vector<32x16xbf16>
    %c0_16 = arith.constant 0 : index
    %c0_17 = arith.constant 0 : index
    %14 = vector.load %arg4[%c0_16, %c0_17] : memref<96x32xbf16, #tpu.memory_space<vmem>>, vector<96x32xbf16>
    %c0_18 = arith.constant 0 : index
    %c0_19 = arith.constant 0 : index
    %15 = vector.load %arg5[%c0_18, %c0_19] : memref<32x32xbf16, #tpu.memory_space<vmem>>, vector<32x32xbf16>
    %c0_20 = arith.constant 0 : index
    %c0_21 = arith.constant 0 : index
    %16 = vector.load %arg6[%c0_20, %c0_21] : memref<32x32xbf16, #tpu.memory_space<vmem>>, vector<32x32xbf16>
    %c0_22 = arith.constant 0 : index
    %c0_23 = arith.constant 0 : index
    %17 = vector.load %arg7[%c0_22, %c0_23] : memref<32x32xbf16, #tpu.memory_space<vmem>>, vector<32x32xbf16>
    %cst = arith.constant 8.000000e+00 : f32
    %18 = math.sqrt %cst : f32
    %cst_24 = arith.constant 1.000000e+00 : f32
    %19 = arith.divf %cst_24, %18 : f32
    %20 = vector.extract_strided_slice %14 {offsets = [0, 0], sizes = [32, 32], strides = [1, 1]} : vector<96x32xbf16> to vector<32x32xbf16>
    %cst_25 = arith.constant dense<0.000000e+00> : vector<32x16xf32>
    %21 = tpu.matmul %20, %11, %cst_25 {dimension_numbers = #tpu.dot_dimension_numbers<[1], [0], [0], [1], [0, 0, 1, 1], [], []>} : vector<32x32xbf16>, vector<32x16xbf16>, vector<32x16xf32> -> vector<32x16xf32>
    %22 = vector.broadcast %0 : vector<32x1xf32> to vector<32x16xf32>
    %23 = arith.addf %21, %22 : vector<32x16xf32>
    %24 = vector.extract_strided_slice %14 {offsets = [32, 0], sizes = [64, 32], strides = [1, 1]} : vector<96x32xbf16> to vector<64x32xbf16>
    %cst_26 = arith.constant dense<0.000000e+00> : vector<64x16xf32>
    %25 = tpu.matmul %24, %13, %cst_26 {dimension_numbers = #tpu.dot_dimension_numbers<[1], [0], [0], [1], [0, 0, 1, 1], [], []>} : vector<64x32xbf16>, vector<32x16xbf16>, vector<64x16xf32> -> vector<64x16xf32>
    %26 = vector.extract_strided_slice %25 {offsets = [0, 0], sizes = [32, 16], strides = [1, 1]} : vector<64x16xf32> to vector<32x16xf32>
    %27 = vector.broadcast %1 : vector<32x1xf32> to vector<32x16xf32>
    %28 = arith.addf %26, %27 : vector<32x16xf32>
    %29 = vector.extract_strided_slice %25 {offsets = [32, 0], sizes = [32, 16], strides = [1, 1]} : vector<64x16xf32> to vector<32x16xf32>
    %30 = vector.broadcast %2 : vector<32x1xf32> to vector<32x16xf32>
    %31 = arith.addf %29, %30 : vector<32x16xf32>
    %32 = vector.extract_strided_slice %23 {offsets = [0, 0], sizes = [8, 16], strides = [1, 1]} : vector<32x16xf32> to vector<8x16xf32>
    %33 = vector.broadcast %19 : f32 to vector<8x16xf32>
    %34 = arith.mulf %32, %33 : vector<8x16xf32>
    %35 = arith.truncf %34 : vector<8x16xf32> to vector<8x16xbf16>
    %36 = vector.extract_strided_slice %28 {offsets = [0, 0], sizes = [8, 16], strides = [1, 1]} : vector<32x16xf32> to vector<8x16xf32>
    %37 = arith.truncf %36 : vector<8x16xf32> to vector<8x16xbf16>
    %38 = vector.extract_strided_slice %31 {offsets = [0, 0], sizes = [8, 16], strides = [1, 1]} : vector<32x16xf32> to vector<8x16xf32>
    %39 = arith.truncf %38 : vector<8x16xf32> to vector<8x16xbf16>
    %cst_27 = arith.constant dense<0.000000e+00> : vector<16x16xf32>
    %40 = tpu.matmul %35, %37, %cst_27 {dimension_numbers = #tpu.dot_dimension_numbers<[0], [0], [1], [1], [0, 1, 1, 1], [], []>} : vector<8x16xbf16>, vector<8x16xbf16>, vector<16x16xf32> -> vector<16x16xf32>
    %cst_28 = arith.constant dense<0xFF800000> : vector<16xf32>
    %41 = vector.multi_reduction <maximumf>, %40, %cst_28 [1] : vector<16x16xf32> to vector<16xf32>
    %42 = vector.shape_cast %41 : vector<16xf32> to vector<16x1xf32>
    %43 = vector.broadcast %42 : vector<16x1xf32> to vector<16x16xf32>
    %44 = arith.subf %40, %43 : vector<16x16xf32>
    %45 = math.exp %44 : vector<16x16xf32>
    %cst_29 = arith.constant dense<0.000000e+00> : vector<16xf32>
    %46 = vector.multi_reduction <add>, %45, %cst_29 [1] : vector<16x16xf32> to vector<16xf32>
    %47 = vector.shape_cast %46 : vector<16xf32> to vector<16x1xf32>
    %cst_30 = arith.constant 1.000000e+00 : f32
    %48 = vector.broadcast %cst_30 : f32 to vector<16x1xf32>
    %49 = arith.divf %48, %47 : vector<16x1xf32>
    %50 = vector.broadcast %49 : vector<16x1xf32> to vector<16x16xf32>
    %51 = arith.mulf %45, %50 : vector<16x16xf32>
    %52 = arith.truncf %51 : vector<16x16xf32> to vector<16x16xbf16>
    %cst_31 = arith.constant dense<0.000000e+00> : vector<8x16xf32>
    %53 = tpu.matmul %39, %52, %cst_31 {dimension_numbers = #tpu.dot_dimension_numbers<[1], [1], [0], [0], [0, 0, 1, 0], [], []>} : vector<8x16xbf16>, vector<16x16xbf16>, vector<8x16xf32> -> vector<8x16xf32>
    %54 = vector.extract_strided_slice %23 {offsets = [8, 0], sizes = [8, 16], strides = [1, 1]} : vector<32x16xf32> to vector<8x16xf32>
    %55 = vector.broadcast %19 : f32 to vector<8x16xf32>
    %56 = arith.mulf %54, %55 : vector<8x16xf32>
    %57 = arith.truncf %56 : vector<8x16xf32> to vector<8x16xbf16>
    %58 = vector.extract_strided_slice %28 {offsets = [8, 0], sizes = [8, 16], strides = [1, 1]} : vector<32x16xf32> to vector<8x16xf32>
    %59 = arith.truncf %58 : vector<8x16xf32> to vector<8x16xbf16>
    %60 = vector.extract_strided_slice %31 {offsets = [8, 0], sizes = [8, 16], strides = [1, 1]} : vector<32x16xf32> to vector<8x16xf32>
    %61 = arith.truncf %60 : vector<8x16xf32> to vector<8x16xbf16>
    %cst_32 = arith.constant dense<0.000000e+00> : vector<16x16xf32>
    %62 = tpu.matmul %57, %59, %cst_32 {dimension_numbers = #tpu.dot_dimension_numbers<[0], [0], [1], [1], [0, 1, 1, 1], [], []>} : vector<8x16xbf16>, vector<8x16xbf16>, vector<16x16xf32> -> vector<16x16xf32>
    %cst_33 = arith.constant dense<0xFF800000> : vector<16xf32>
    %63 = vector.multi_reduction <maximumf>, %62, %cst_33 [1] : vector<16x16xf32> to vector<16xf32>
    %64 = vector.shape_cast %63 : vector<16xf32> to vector<16x1xf32>
    %65 = vector.broadcast %64 : vector<16x1xf32> to vector<16x16xf32>
    %66 = arith.subf %62, %65 : vector<16x16xf32>
    %67 = math.exp %66 : vector<16x16xf32>
    %cst_34 = arith.constant dense<0.000000e+00> : vector<16xf32>
    %68 = vector.multi_reduction <add>, %67, %cst_34 [1] : vector<16x16xf32> to vector<16xf32>
    %69 = vector.shape_cast %68 : vector<16xf32> to vector<16x1xf32>
    %cst_35 = arith.constant 1.000000e+00 : f32
    %70 = vector.broadcast %cst_35 : f32 to vector<16x1xf32>
    %71 = arith.divf %70, %69 : vector<16x1xf32>
    %72 = vector.broadcast %71 : vector<16x1xf32> to vector<16x16xf32>
    %73 = arith.mulf %67, %72 : vector<16x16xf32>
    %74 = arith.truncf %73 : vector<16x16xf32> to vector<16x16xbf16>
    %cst_36 = arith.constant dense<0.000000e+00> : vector<8x16xf32>
    %75 = tpu.matmul %61, %74, %cst_36 {dimension_numbers = #tpu.dot_dimension_numbers<[1], [1], [0], [0], [0, 0, 1, 0], [], []>} : vector<8x16xbf16>, vector<16x16xbf16>, vector<8x16xf32> -> vector<8x16xf32>
    %76 = vector.extract_strided_slice %23 {offsets = [16, 0], sizes = [8, 16], strides = [1, 1]} : vector<32x16xf32> to vector<8x16xf32>
    %77 = vector.broadcast %19 : f32 to vector<8x16xf32>
    %78 = arith.mulf %76, %77 : vector<8x16xf32>
    %79 = arith.truncf %78 : vector<8x16xf32> to vector<8x16xbf16>
    %80 = vector.extract_strided_slice %28 {offsets = [16, 0], sizes = [8, 16], strides = [1, 1]} : vector<32x16xf32> to vector<8x16xf32>
    %81 = arith.truncf %80 : vector<8x16xf32> to vector<8x16xbf16>
    %82 = vector.extract_strided_slice %31 {offsets = [16, 0], sizes = [8, 16], strides = [1, 1]} : vector<32x16xf32> to vector<8x16xf32>
    %83 = arith.truncf %82 : vector<8x16xf32> to vector<8x16xbf16>
    %cst_37 = arith.constant dense<0.000000e+00> : vector<16x16xf32>
    %84 = tpu.matmul %79, %81, %cst_37 {dimension_numbers = #tpu.dot_dimension_numbers<[0], [0], [1], [1], [0, 1, 1, 1], [], []>} : vector<8x16xbf16>, vector<8x16xbf16>, vector<16x16xf32> -> vector<16x16xf32>
    %cst_38 = arith.constant dense<0xFF800000> : vector<16xf32>
    %85 = vector.multi_reduction <maximumf>, %84, %cst_38 [1] : vector<16x16xf32> to vector<16xf32>
    %86 = vector.shape_cast %85 : vector<16xf32> to vector<16x1xf32>
    %87 = vector.broadcast %86 : vector<16x1xf32> to vector<16x16xf32>
    %88 = arith.subf %84, %87 : vector<16x16xf32>
    %89 = math.exp %88 : vector<16x16xf32>
    %cst_39 = arith.constant dense<0.000000e+00> : vector<16xf32>
    %90 = vector.multi_reduction <add>, %89, %cst_39 [1] : vector<16x16xf32> to vector<16xf32>
    %91 = vector.shape_cast %90 : vector<16xf32> to vector<16x1xf32>
    %cst_40 = arith.constant 1.000000e+00 : f32
    %92 = vector.broadcast %cst_40 : f32 to vector<16x1xf32>
    %93 = arith.divf %92, %91 : vector<16x1xf32>
    %94 = vector.broadcast %93 : vector<16x1xf32> to vector<16x16xf32>
    %95 = arith.mulf %89, %94 : vector<16x16xf32>
    %96 = arith.truncf %95 : vector<16x16xf32> to vector<16x16xbf16>
    %cst_41 = arith.constant dense<0.000000e+00> : vector<8x16xf32>
    %97 = tpu.matmul %83, %96, %cst_41 {dimension_numbers = #tpu.dot_dimension_numbers<[1], [1], [0], [0], [0, 0, 1, 0], [], []>} : vector<8x16xbf16>, vector<16x16xbf16>, vector<8x16xf32> -> vector<8x16xf32>
    %98 = vector.extract_strided_slice %23 {offsets = [24, 0], sizes = [8, 16], strides = [1, 1]} : vector<32x16xf32> to vector<8x16xf32>
    %99 = vector.broadcast %19 : f32 to vector<8x16xf32>
    %100 = arith.mulf %98, %99 : vector<8x16xf32>
    %101 = arith.truncf %100 : vector<8x16xf32> to vector<8x16xbf16>
    %102 = vector.extract_strided_slice %28 {offsets = [24, 0], sizes = [8, 16], strides = [1, 1]} : vector<32x16xf32> to vector<8x16xf32>
    %103 = arith.truncf %102 : vector<8x16xf32> to vector<8x16xbf16>
    %104 = vector.extract_strided_slice %31 {offsets = [24, 0], sizes = [8, 16], strides = [1, 1]} : vector<32x16xf32> to vector<8x16xf32>
    %105 = arith.truncf %104 : vector<8x16xf32> to vector<8x16xbf16>
    %cst_42 = arith.constant dense<0.000000e+00> : vector<16x16xf32>
    %106 = tpu.matmul %101, %103, %cst_42 {dimension_numbers = #tpu.dot_dimension_numbers<[0], [0], [1], [1], [0, 1, 1, 1], [], []>} : vector<8x16xbf16>, vector<8x16xbf16>, vector<16x16xf32> -> vector<16x16xf32>
    %cst_43 = arith.constant dense<0xFF800000> : vector<16xf32>
    %107 = vector.multi_reduction <maximumf>, %106, %cst_43 [1] : vector<16x16xf32> to vector<16xf32>
    %108 = vector.shape_cast %107 : vector<16xf32> to vector<16x1xf32>
    %109 = vector.broadcast %108 : vector<16x1xf32> to vector<16x16xf32>
    %110 = arith.subf %106, %109 : vector<16x16xf32>
    %111 = math.exp %110 : vector<16x16xf32>
    %cst_44 = arith.constant dense<0.000000e+00> : vector<16xf32>
    %112 = vector.multi_reduction <add>, %111, %cst_44 [1] : vector<16x16xf32> to vector<16xf32>
    %113 = vector.shape_cast %112 : vector<16xf32> to vector<16x1xf32>
    %cst_45 = arith.constant 1.000000e+00 : f32
    %114 = vector.broadcast %cst_45 : f32 to vector<16x1xf32>
    %115 = arith.divf %114, %113 : vector<16x1xf32>
    %116 = vector.broadcast %115 : vector<16x1xf32> to vector<16x16xf32>
    %117 = arith.mulf %111, %116 : vector<16x16xf32>
    %118 = arith.truncf %117 : vector<16x16xf32> to vector<16x16xbf16>
    %cst_46 = arith.constant dense<0.000000e+00> : vector<8x16xf32>
    %119 = tpu.matmul %105, %118, %cst_46 {dimension_numbers = #tpu.dot_dimension_numbers<[1], [1], [0], [0], [0, 0, 1, 0], [], []>} : vector<8x16xbf16>, vector<16x16xbf16>, vector<8x16xf32> -> vector<8x16xf32>
    %120 = tpu.concatenate %53, %75, %97, %119 in 0 : vector<8x16xf32>, vector<8x16xf32>, vector<8x16xf32>, vector<8x16xf32> -> vector<32x16xf32>
    %121 = arith.truncf %120 : vector<32x16xf32> to vector<32x16xbf16>
    %cst_47 = arith.constant dense<0.000000e+00> : vector<32x16xf32>
    %122 = tpu.matmul %15, %121, %cst_47 {dimension_numbers = #tpu.dot_dimension_numbers<[1], [0], [0], [1], [0, 0, 1, 1], [], []>} : vector<32x32xbf16>, vector<32x16xbf16>, vector<32x16xf32> -> vector<32x16xf32>
    %123 = vector.broadcast %3 : vector<32x1xf32> to vector<32x16xf32>
    %124 = arith.addf %122, %123 : vector<32x16xf32>
    %125 = arith.extf %11 : vector<32x16xbf16> to vector<32x16xf32>
    %126 = arith.addf %125, %124 : vector<32x16xf32>
    %cst_48 = arith.constant dense<0.000000e+00> : vector<16xf32>
    %127 = vector.multi_reduction <add>, %126, %cst_48 [0] : vector<32x16xf32> to vector<16xf32>
    %128 = vector.shape_cast %127 : vector<16xf32> to vector<1x16xf32>
    %cst_49 = arith.constant 3.200000e+01 : f32
    %129 = vector.broadcast %cst_49 : f32 to vector<1x16xf32>
    %130 = arith.divf %128, %129 : vector<1x16xf32>
    %131 = vector.broadcast %130 : vector<1x16xf32> to vector<32x16xf32>
    %132 = arith.subf %126, %131 : vector<32x16xf32>
    %133 = arith.mulf %132, %132 : vector<32x16xf32>
    %cst_50 = arith.constant dense<0.000000e+00> : vector<16xf32>
    %134 = vector.multi_reduction <add>, %133, %cst_50 [0] : vector<32x16xf32> to vector<16xf32>
    %135 = vector.shape_cast %134 : vector<16xf32> to vector<1x16xf32>
    %cst_51 = arith.constant 3.200000e+01 : f32
    %136 = vector.broadcast %cst_51 : f32 to vector<1x16xf32>
    %137 = arith.divf %135, %136 : vector<1x16xf32>
    %138 = vector.broadcast %130 : vector<1x16xf32> to vector<32x16xf32>
    %139 = arith.subf %126, %138 : vector<32x16xf32>
    %cst_52 = arith.constant 9.99999974E-6 : f32
    %140 = vector.broadcast %cst_52 : f32 to vector<1x16xf32>
    %141 = arith.addf %137, %140 : vector<1x16xf32>
    %142 = math.rsqrt %141 : vector<1x16xf32>
    %143 = vector.broadcast %142 : vector<1x16xf32> to vector<32x16xf32>
    %144 = arith.mulf %139, %143 : vector<32x16xf32>
    %145 = vector.broadcast %4 : vector<32x1xf32> to vector<32x16xf32>
    %146 = arith.mulf %144, %145 : vector<32x16xf32>
    %147 = vector.broadcast %5 : vector<32x1xf32> to vector<32x16xf32>
    %148 = arith.addf %146, %147 : vector<32x16xf32>
    %149 = arith.truncf %148 : vector<32x16xf32> to vector<32x16xbf16>
    %cst_53 = arith.constant dense<0.000000e+00> : vector<32x16xf32>
    %150 = tpu.matmul %16, %149, %cst_53 {dimension_numbers = #tpu.dot_dimension_numbers<[1], [0], [0], [1], [0, 0, 1, 1], [], []>} : vector<32x32xbf16>, vector<32x16xbf16>, vector<32x16xf32> -> vector<32x16xf32>
    %151 = vector.broadcast %6 : vector<32x1xf32> to vector<32x16xf32>
    %152 = arith.addf %150, %151 : vector<32x16xf32>
    %cst_54 = arith.constant 0.000000e+00 : f32
    %153 = vector.broadcast %cst_54 : f32 to vector<32x16xf32>
    %154 = arith.maximumf %152, %153 : vector<32x16xf32>
    %155 = arith.truncf %154 : vector<32x16xf32> to vector<32x16xbf16>
    %cst_55 = arith.constant dense<0.000000e+00> : vector<32x16xf32>
    %156 = tpu.matmul %17, %155, %cst_55 {dimension_numbers = #tpu.dot_dimension_numbers<[1], [0], [0], [1], [0, 0, 1, 1], [], []>} : vector<32x32xbf16>, vector<32x16xbf16>, vector<32x16xf32> -> vector<32x16xf32>
    %157 = vector.broadcast %7 : vector<32x1xf32> to vector<32x16xf32>
    %158 = arith.addf %156, %157 : vector<32x16xf32>
    %159 = arith.addf %148, %158 : vector<32x16xf32>
    %cst_56 = arith.constant dense<0.000000e+00> : vector<16xf32>
    %160 = vector.multi_reduction <add>, %159, %cst_56 [0] : vector<32x16xf32> to vector<16xf32>
    %161 = vector.shape_cast %160 : vector<16xf32> to vector<1x16xf32>
    %cst_57 = arith.constant 3.200000e+01 : f32
    %162 = vector.broadcast %cst_57 : f32 to vector<1x16xf32>
    %163 = arith.divf %161, %162 : vector<1x16xf32>
    %164 = vector.broadcast %163 : vector<1x16xf32> to vector<32x16xf32>
    %165 = arith.subf %159, %164 : vector<32x16xf32>
    %166 = arith.mulf %165, %165 : vector<32x16xf32>
    %cst_58 = arith.constant dense<0.000000e+00> : vector<16xf32>
    %167 = vector.multi_reduction <add>, %166, %cst_58 [0] : vector<32x16xf32> to vector<16xf32>
    %168 = vector.shape_cast %167 : vector<16xf32> to vector<1x16xf32>
    %cst_59 = arith.constant 3.200000e+01 : f32
    %169 = vector.broadcast %cst_59 : f32 to vector<1x16xf32>
    %170 = arith.divf %168, %169 : vector<1x16xf32>
    %171 = vector.broadcast %163 : vector<1x16xf32> to vector<32x16xf32>
    %172 = arith.subf %159, %171 : vector<32x16xf32>
    %cst_60 = arith.constant 9.99999974E-6 : f32
    %173 = vector.broadcast %cst_60 : f32 to vector<1x16xf32>
    %174 = arith.addf %170, %173 : vector<1x16xf32>
    %175 = math.rsqrt %174 : vector<1x16xf32>
    %176 = vector.broadcast %175 : vector<1x16xf32> to vector<32x16xf32>
    %177 = arith.mulf %172, %176 : vector<32x16xf32>
    %178 = vector.broadcast %8 : vector<32x1xf32> to vector<32x16xf32>
    %179 = arith.mulf %177, %178 : vector<32x16xf32>
    %180 = vector.broadcast %9 : vector<32x1xf32> to vector<32x16xf32>
    %181 = arith.addf %179, %180 : vector<32x16xf32>
    %c0_61 = arith.constant 0 : index
    %c0_62 = arith.constant 0 : index
    %c0_63 = arith.constant 0 : index
    %182 = vector.load %arg9[%c0_61, %c0_62, %c0_63] : memref<1x32x16xf32, #tpu.memory_space<vmem>>, vector<1x32x16xf32>
    %183 = vector.shape_cast %182 : vector<1x32x16xf32> to vector<32x16xf32>
    %184 = vector.shape_cast %181 : vector<32x16xf32> to vector<1x32x16xf32>
    tpu.vector_store %arg9[%c0_61, %c0_62, %c0_63], %184 {strides = array<i32>} : memref<1x32x16xf32, #tpu.memory_space<vmem>>, vector<1x32x16xf32>,
    return
  }
  func.func @transform_0(%arg0: i32, %arg1: i32) -> (i32, i32, i32) {
    %c0_i32 = arith.constant 0 : i32
    %c0_i32_0 = arith.constant 0 : i32
    return %arg0, %c0_i32, %arg1 : i32, i32, i32
  }
  func.func @transform_1(%arg0: i32, %arg1: i32) -> (i32, i32, i32) {
    %c0_i32 = arith.constant 0 : i32
    %c0_i32_0 = arith.constant 0 : i32
    %c0_i32_1 = arith.constant 0 : i32
    return %arg0, %c0_i32, %c0_i32_0 : i32, i32, i32
  }
  func.func @transform_2(%arg0: i32, %arg1: i32) -> (i32, i32) {
    %c0_i32 = arith.constant 0 : i32
    %c0_i32_0 = arith.constant 0 : i32
    %c0_i32_1 = arith.constant 0 : i32
    return %c0_i32, %c0_i32_0 : i32, i32
  }
  func.func @transform_3(%arg0: i32, %arg1: i32) -> (i32, i32) {
    %c0_i32 = arith.constant 0 : i32
    %c0_i32_0 = arith.constant 0 : i32
    %c0_i32_1 = arith.constant 0 : i32
    return %c0_i32, %c0_i32_0 : i32, i32
  }
  func.func @transform_4(%arg0: i32, %arg1: i32) -> (i32, i32) {
    %c0_i32 = arith.constant 0 : i32
    %c0_i32_0 = arith.constant 0 : i32
    %c0_i32_1 = arith.constant 0 : i32
    return %c0_i32, %c0_i32_0 : i32, i32
  }
  func.func @transform_5(%arg0: i32, %arg1: i32) -> (i32, i32) {
    %c0_i32 = arith.constant 0 : i32
    %c0_i32_0 = arith.constant 0 : i32
    %c0_i32_1 = arith.constant 0 : i32
    return %c0_i32, %c0_i32_0 : i32, i32
  }
  func.func @transform_6(%arg0: i32, %arg1: i32) -> (i32, i32) {
    %c0_i32 = arith.constant 0 : i32
    %c0_i32_0 = arith.constant 0 : i32
    %c0_i32_1 = arith.constant 0 : i32
    return %c0_i32, %c0_i32_0 : i32, i32
  }
  func.func @transform_7(%arg0: i32, %arg1: i32) -> (i32, i32, i32) {
    %c0_i32 = arith.constant 0 : i32
    %c0_i32_0 = arith.constant 0 : i32
    return %arg0, %c0_i32, %arg1 : i32, i32, i32
  }
}

</mosaic_0001>

<bundles_post_ra>
// kernel: pointnet_fp_forward.2
= control target key start
LH: loop header
LB: loop body
LE: loop exit
PB: predicated region body
PF: predicated region fallthrough
CT: control target
= control target key end

     0   :  { %s1177_s24 = smov 0   ;;  %s1179_s25 = smov 0   ;;  %s1326_s0 = inlined_call_operand.vmem [shape: f32[2,3,16], index: 0, kind: input, shape index: {}]   ;;  %s1327_s1 = inlined_call_operand.vmem [shape: f32[2,8,3], index: 1, kind: input, shape index: {}]   ;;  %s1328_s2 = inlined_call_operand.vmem [shape: bf16[2,4,16], index: 2, kind: input, shape index: {}]   ;;  %s1329_s3 = inlined_call_operand.vmem [shape: bf16[2,32,8], index: 3, kind: input, shape index: {}]   ;;  %s1330_s4 = inlined_call_operand.vmem [shape: bf16[32,4], index: 4, kind: input, shape index: {}]   ;;  %s1331_s5 = inlined_call_operand.vmem [shape: bf16[32,32], index: 5, kind: input, shape index: {}]   ;;  %s1332_s6 = inlined_call_operand.vmem [shape: f32[32,4], index: 6, kind: input, shape index: {}]   ;;  %s1333_s7 = inlined_call_operand.vmem [shape: bf16[2,32,16], index: 7, kind: output, shape index: {}]  }
   0x1   :  { %s1181_s26 = smov 0  }
   0x2 LB: > { %s29_s27 = sadd.s32 1, %s1127_s25  ;;  %p980_p0 = scmp.ge.s32.totalorder %s1131_s26, 1  ;;  %s1131_s26 = sphi %s1181_s26, %s17_s26   ;;  %s1127_s25 = sphi %s1179_s25, %s1335_s25   ;;  %s1123_s24 = sphi %s1177_s24, %s1334_s24  }
   0x3   : > { %p31_p1 = scmp.ge.s32.totalorder %s29_s27, 2  ;;  %p288_p2 = scmp.lt.s32.totalorder %s1131_s26, 3 }
   0x5   : > { %s1337_s27 = smov (%p31_p1, %s29_s27), 0  ;;  %p289_p3 = pnand %p980_p0, %p288_p2 }
   0x6   : > { %p341_p4 = scmp.lt.s32.totalorder (!%p289_p3), %s1123_s24, 1  ;;  %v1133_v0 = vmov (!%p289_p3), 0   ;;  %v1134_v1 = vmov (!%p289_p3), 2   ;;  %v1135_v3 = vmov (!%p289_p3), 1   ;;  %vm553_vm0 = vcmask (!%p289_p3), 1041408   ;;  %v1089_v4 = vld [vmem:[%s1330_s4] sm:$0xff] (!%p289_p3)  }
   0x7   : > { %292 = sbr.rel (%p289_p3) target bundleno = 738 (0x2e2), region = 48  ;;  %1076 = vset.pattern.permute.xlu0 (!%p289_p3), %v1133_v0  ;;  %1078 = vset.pattern.permute.xlu1 (!%p289_p3), %v1134_v1  ;;  %vm546_vm1 = vcmask (!%p289_p3), 31744   ;;  %v1090_v7 = vld [vmem:[%s1330_s4 + $0x8] sm:$0xff] (!%p289_p3)   ;;  %v380_v8 = vlaneseq (!%p289_p3)  ;;  %vm616_vm2 = vcmask (!%p289_p3), 64512   ;;  %v1238_v28 = vld [vmem:[%s1332_s6] sm:$0xff] (!%p289_p3)  ;;  %v1243_v29 = vld [vmem:[%s1332_s6 + $0x10] sm:$0xff] (!%p289_p3) }
   0x8   : > { %1024 = vmatprep.mubr.msk.bf16.mxu0 (!%p289_p3), %vm546_vm1, %v1089_v4  ;;  %vm410_vm3 = vcmask (!%p289_p3), 130048   ;;  %v1250_v31 = vld [vmem:[%s1332_s6 + $0x8] sm:$0xff] (!%p289_p3)  ;;  %v1260_v36 = vld [vmem:[%s1332_s6 + $0x18] sm:$0xff] (!%p289_p3) }
   0x9   : > { %v1217_v9 = vshrl.u32 (!%p289_p3), %v380_v8, 7 }
   0xb   : > { %v382_v10 = vsub.s32 (!%p289_p3), 0, %v1217_v9  ;;  %v403_v11 = vsub.s32 (!%p289_p3), 2, %v1217_v9  ;;  %v392_v13 = vsub.s32 (!%p289_p3), 1, %v1217_v9 }
   0xe   : > { %s1339_s24 = smov (!%p341_p4, %s1123_s24), 1 }
   0xf   : > { %s982_s28 = sshll.u32 %s1339_s24, 3  ;;  %s983_s9 = sshll.u32 %s1339_s24, 1 }
  0x10   : > { %s351_s8 = scalar_lea.vmem %s1327_s1, %s982_s28  ;;  %s358_s14 = scalar_lea.vmem %s1328_s2, %s983_s9 }
  0x11   : > { %v374_v2 = vld [vmem:[%s351_s8] sm:$0xff]  ;;  %s981_s17 = sshll.u32 %s1339_s24, 2  ;;  %s1006_s21 = sshll.u32 %s1339_s24, 4 }
  0x12   : > { %377 = vperm.xlu0 %1076, %v374_v2   ;;  %398 = vperm.xlu1 %1078, %v374_v2   ;;  %v526_v5 = vld [vmem:[%s358_s14] sm:$0x3]  ;;  %s347_s20 = scalar_lea.vmem %s1326_s0, %s981_s17  ;;  %s1231_s28 = scalar_lea.vmem %s1329_s3, %s1006_s21 }
  0x13   : > { %1046 = vmatprep.subr.msk.bf16.mxu0 %vm553_vm0, %v526_v5  ;;  %v555_v6 = vsel %vm553_vm0, %v526_v5, 0  ;;  %v373_v12 = vld [vmem:[%s347_s20] sm:$0x7]  ;;  %s371_s20 = scalar_lea.vmem %s1333_s7, %s1006_s21 }
  0x14   : > { %1023 = vmatpush3.bf16.msra.mxu0 %v555_v6  ;;  %v383_v15 = vrot.slane %v373_v12, %v382_v10  ;;  %v404_v16 = vrot.slane %v373_v12, %v403_v11  ;;  %v393_v18 = vrot.slane %v373_v12, %v392_v13  ;;  %v1091_v26 = vld [vmem:[%s1231_s28] sm:$0xff]  }
  0x16   : > { %1077 = vset.pattern.permute.xlu0 %v1135_v3  ;;  %1079 = vset.pattern.permute.xlu1 %v1133_v0 }
  0x17   : > { %387 = vperm.xlu0 %1077, %v374_v2   ;;  %1025 = vmatmul.mubr.msk.bf16.vlgmr.msra.gmra.mrb[0].mxu0 %vm546_vm1, %v1090_v7 }
  0x18   : > { %1030 = vmatprep.mubr.msk.bf16.mxu0 %vm616_vm2, %v1091_v26  ;;  %678 = vperm.xlu1 %1079, %v1238_v28  }
  0x1b   : > { %1081 = vset.pattern.permute.xlu0 %v1133_v0 }
  0x1c   : > { %688 = vperm.xlu0 %1081, %v1243_v29   ;;  %683 = vperm.xlu1 %1079, %v1250_v31  }
  0x20   : > { %1082 = vset.pattern.permute.xlu0 %v1135_v3  ;;  %1080 = vset.pattern.permute.xlu1 %v1135_v3 }
  0x21   : > { %701 = vperm.xlu0 %1082, %v1238_v28   ;;  %705 = vperm.xlu1 %1080, %v1250_v31  }
  0x25   : > { %713 = vperm.xlu0 %1082, %v1260_v36   ;;  %1083 = vset.pattern.permute.xlu1 %v1133_v0 }
  0x26   : > { %693 = vperm.xlu1 %1083, %v1260_v36  }
  0x29   : > { %1086 = vset.pattern.permute.xlu0 %v1134_v1 }
  0x2a   : > { %801 = vperm.xlu0 %1086, %v1243_v29   ;;  %1084 = vset.pattern.permute.xlu1 %v1135_v3 }
  0x2b   : > { %709 = vperm.xlu1 %1084, %v1243_v29  }
  0x2f   : > { %1085 = vset.pattern.permute.xlu1 %v1134_v1 }
  0x30   : > { %793 = vperm.xlu1 %1085, %v1238_v28  }
  0x34   : > { %797 = vperm.xlu1 %1085, %v1250_v31  }
  0x38   : > { %805 = vperm.xlu1 %1085, %v1260_v36  }
  0x91   : > { %v378_v14 = vpop.permute.xlu0 %377  ;;  %v399_v17 = vpop.permute.xlu1 %398 }
  0x92   : > { %v384_v19 = vsub.f32 %v378_v14, %v383_v15  ;;  %v405_v20 = vsub.f32 %v399_v17, %v404_v16 }
  0x94   : > { %v385_v23 = vmul.f32 %v384_v19, %v384_v19  ;;  %v406_v25 = vmul.f32 %v405_v20, %v405_v20 }
  0x96   : > { %v388_v21 = vpop.permute.xlu0 %387 }
  0x97   : > { %v394_v22 = vsub.f32 %v388_v21, %v393_v18 }
  0x99   : > { %v395_v24 = vmul.f32 %v394_v22, %v394_v22 }
  0x9b   : > { %v396_v27 = vadd.f32 %v395_v24, %v385_v23 }
  0x9d   : > { %v407_v30 = vadd.f32 %v406_v25, %v396_v27 }
  0x9f   : > { %v411_v32 = vsel %vm410_vm3, %v407_v30, inf }
  0xa0   : > { %v412_v33 = vrot.slane %v411_v32, 4 }
  0xa2   : > { %v413_v34 = vmin.f32 %v411_v32, %v412_v33 }
  0xa4   : > { %v414_v35 = vrot.slane %v413_v34, 2 }
  0xa6   : > { %v415_v37 = vmin.f32 %v413_v34, %v414_v35 }
  0xa8   : > { %v416_v38 = vrot.slane %v415_v37, 1 }
  0xaa   : > { %v417_v39 = vmin.f32 %v415_v37, %v416_v38 }
  0xac   : > { %vm418_vm4 = vcmp.eq.f32.partialorder %v407_v30, %v417_v39  ;;  %v431_v1 = vmax.f32 %v417_v39, 0.0 }
  0xad   : > { %v419_v40 = vsel %vm418_vm4, %v1217_v9, 8 }
  0xae   : > { %v420_v41 = vsel %vm410_vm3, %v419_v40, 2147483647  ;;  %vm434_vm0 = vcmp.eq.f32.partialorder %v431_v1, inf  ;;  %v437_v22 = vand.u32 2147483648, %v431_v1  ;;  %vm436_vm4 = vcmp.eq.f32.partialorder %v431_v1, 0.0 }
  0xaf   : > { %v421_v42 = vrot.slane %v420_v41, 4 }
  0xb1   : > { %vm422_vm5 = vcmp.lt.s32.totalorder %v420_v41, %v421_v42 }
  0xb2   : > { %v423_v43 = vsel %vm422_vm5, %v420_v41, %v421_v42 }
  0xb3   : > { %v424_v44 = vrot.slane %v423_v43, 2 }
  0xb5   : > { %vm425_vm6 = vcmp.lt.s32.totalorder %v423_v43, %v424_v44 }
  0xb6   : > { %v426_v45 = vsel %vm425_vm6, %v423_v43, %v424_v44 }
  0xb7   : > { %v427_v46 = vrot.slane %v426_v45, 1 }
  0xb9   : > { %vm428_vm7 = vcmp.lt.s32.totalorder %v426_v45, %v427_v46 }
  0xba   : > { %v1275_v47 = vsel %vm428_vm7, %v426_v45, %v427_v46 }
  0xbb   : > { %vm430_vm8 = vcmp.eq.s32.totalorder %v1217_v9, %v1275_v47  ;;  %v679_v47 = vpop.permute.xlu1 %678 }
  0xbc   : > { %v445_v48 = vsel %vm430_vm8, inf, %v407_v30 }
  0xbd   : > { %v446_v49 = vsel %vm410_vm3, %v445_v48, inf }
  0xbe   : > { %v447_v50 = vrot.slane %v446_v49, 4 }
  0xc0   : > { %v448_v51 = vmin.f32 %v446_v49, %v447_v50 }
  0xc2   : > { %v449_v52 = vrot.slane %v448_v51, 2 }
  0xc4   : > { %v450_v53 = vmin.f32 %v448_v51, %v449_v52 }
  0xc6   : > { %v451_v54 = vrot.slane %v450_v53, 1 }
  0xc8   : > { %v452_v55 = vmin.f32 %v450_v53, %v451_v54 }
  0xca   : > { %vm453_vm9 = vcmp.eq.f32.partialorder %v445_v48, %v452_v55  ;;  %v466_v0 = vmax.f32 %v452_v55, 0.0 }
  0xcb   : > { %v454_v56 = vsel %vm453_vm9, %v1217_v9, 8 }
  0xcc   : > { %v455_v57 = vsel %vm410_vm3, %v454_v56, 2147483647  ;;  %1095 = vrsqrt.f32 %v466_v0  ;;  %vm469_vm15 = vcmp.eq.f32.partialorder %v466_v0, inf  ;;  %v472_v19 = vand.u32 2147483648, %v466_v0 }
  0xcd   : > { %v456_v58 = vrot.slane %v455_v57, 4  ;;  %1097 = vrsqrt.f32 %v431_v1  ;;  %vm471_vm1 = vcmp.eq.f32.partialorder %v466_v0, 0.0 }
  0xcf   : > { %vm457_vm10 = vcmp.lt.s32.totalorder %v455_v57, %v456_v58 }
  0xd0   : > { %v458_v59 = vsel %vm457_vm10, %v455_v57, %v456_v58  ;;  %v1092_v57 = vld [vmem:[%s1231_s28 + $0x8] sm:$0xff]   ;;  %v1093_v58 = vld [vmem:[%s1331_s5] sm:$0xff]  }
  0xd1   : > { %v459_v60 = vrot.slane %v458_v59, 2 }
  0xd3   : > { %vm460_vm11 = vcmp.lt.s32.totalorder %v458_v59, %v459_v60 }
  0xd4   : > { %v461_v61 = vsel %vm460_vm11, %v458_v59, %v459_v60  ;;  %vm623_vm11 = vcmask 1043456   ;;  %v684_v59 = vpop.permute.xlu1 %683 }
  0xd5   : > { %v462_v62 = vrot.slane %v461_v61, 1 }
  0xd6   : > { %v1096_v10 = vpop.eup %1095 }
  0xd7   : > { %vm463_vm12 = vcmp.lt.s32.totalorder %v461_v61, %v462_v62  ;;  %v1098_v12 = vpop.eup %1097  ;;  %v468_v14 = vmul.f32 %v1096_v10, %v466_v0 }
  0xd8   : > { %v464_v63 = vsel %vm463_vm12, %v461_v61, %v462_v62  ;;  %v433_v16 = vmul.f32 %v1098_v12, %v431_v1  ;;  %vm736_vm12 = vcmask 261120   ;;  %v706_v60 = vpop.permute.xlu1 %705  ;;  %v689_v61 = vpop.permute.xlu0 %688 }
  0xd9   : > { %vm465_vm13 = vcmp.eq.s32.totalorder %v1217_v9, %v464_v63  ;;  %v470_v18 = vsel %vm469_vm15, %v466_v0, %v468_v14  ;;  %1038 = vmatprep.mubr.msk.bf16.mxu1 %vm736_vm12, %v1093_v58 }
  0xda   : > { %v480_v2 = vsel %vm465_vm13, inf, %v445_v48  ;;  %v435_v20 = vsel %vm434_vm0, %v431_v1, %v433_v16  ;;  %v473_v23 = vsel %vm471_vm1, %v472_v19, %v470_v18 }
  0xdb   : > { %v481_v3 = vsel %vm410_vm3, %v480_v2, inf  ;;  %v438_v24 = vsel %vm436_vm4, %v437_v22, %v435_v20  ;;  %v474_v25 = vadd.f32 1e-08, %v473_v23 }
  0xdc   : > { %v482_v4 = vrot.slane %v481_v3, 4  ;;  %v439_v27 = vadd.f32 1e-08, %v438_v24  ;;  %v694_v62 = vpop.permute.xlu1 %693  ;;  %v702_v63 = vpop.permute.xlu0 %701 }
  0xde   : > { %v483_v5 = vmin.f32 %v481_v3, %v482_v4 }
  0xe0   : > { %v484_v6 = vrot.slane %v483_v5, 2  ;;  %v710_v1 = vpop.permute.xlu1 %709 }
  0xe2   : > { %v485_v7 = vmin.f32 %v483_v5, %v484_v6  ;;  %v714_v6 = vpop.permute.xlu0 %713 }
  0xe4   : > { %v486_v8 = vrot.slane %v485_v7, 1  ;;  %v794_v18 = vpop.permute.xlu1 %793 }
  0xe6   : > { %v487_v11 = vmin.f32 %v485_v7, %v486_v8  ;;  %v802_v22 = vpop.permute.xlu0 %801 }
  0xe8   : > { %vm488_vm14 = vcmp.eq.f32.partialorder %v480_v2, %v487_v11  ;;  %v501_v13 = vmax.f32 %v487_v11, 0.0  ;;  %v798_v19 = vpop.permute.xlu1 %797 }
  0xe9   : > { %v489_v15 = vsel %vm488_vm14, %v1217_v9, 8 }
  0xea   : > { %1099 = vrsqrt.f32 %v501_v13  ;;  %v490_v17 = vsel %vm410_vm3, %v489_v15, 2147483647  ;;  %vm504_vm6 = vcmp.eq.f32.partialorder %v501_v13, inf  ;;  %v507_v33 = vand.u32 2147483648, %v501_v13 }
  0xeb   : > { %v491_v21 = vrot.slane %v490_v17, 4  ;;  %1101 = vrcp.f32 %v474_v25  ;;  %vm506_vm3 = vcmp.eq.f32.partialorder %v501_v13, 0.0 }
  0xec   : > { %1103 = vrcp.f32 %v439_v27  ;;  %v806_v20 = vpop.permute.xlu1 %805 }
  0xed   : > { %vm492_vm5 = vcmp.lt.s32.totalorder %v490_v17, %v491_v21 }
  0xee   : > { %v493_v32 = vsel %vm492_vm5, %v490_v17, %v491_v21  ;;  %v1094_v17 = vld [vmem:[%s1331_s5 + $0x8] sm:$0xff]  }
  0xef   : > { %v494_v37 = vrot.slane %v493_v32, 2 }
  0xf1   : > { %vm495_vm7 = vcmp.lt.s32.totalorder %v493_v32, %v494_v37 }
  0xf2   : > { %v496_v39 = vsel %vm495_vm7, %v493_v32, %v494_v37 }
  0xf3   : > { %v497_v42 = vrot.slane %v496_v39, 1 }
  0xf4   : > { %v1100_v26 = vpop.eup %1099 }
  0xf5   : > { %v503_v30 = vmul.f32 %v1100_v26, %v501_v13  ;;  %v1102_v40 = vpop.eup %1101  ;;  %vm498_vm9 = vcmp.lt.s32.totalorder %v496_v39, %v497_v42 }
  0xf6   : > { %v1104_v41 = vpop.eup %1103  ;;  %v499_v46 = vsel %vm498_vm9, %v496_v39, %v497_v42  ;;  %v477_v48 = vsel %vm465_vm13, %v1102_v40, 0.0 }
  0xf7   : > { %v505_v34 = vsel %vm504_vm6, %v501_v13, %v503_v30  ;;  %v479_v43 = vadd.f32 %v1104_v41, %v1102_v40  ;;  %vm500_vm10 = vcmp.eq.s32.totalorder %v1217_v9, %v499_v46  ;;  %v442_v49 = vsel %vm430_vm8, %v1104_v41, 0.0 }
  0xf8   : > { %v508_v35 = vsel %vm506_vm3, %v507_v33, %v505_v34  ;;  %v478_v51 = vadd.f32 %v477_v48, %v442_v49  ;;  %v1136_v9 = vmov 3  }
  0xf9   : > { %v509_v38 = vadd.f32 1e-08, %v508_v35  ;;  %1087 = vset.pattern.permute.xlu1 %v1136_v9  ;;  %1088 = vset.pattern.permute.xlu0 %v1136_v9 }
  0xfa   : > { %813 = vperm.xlu1 %1087, %v1238_v28   ;;  %817 = vperm.xlu0 %1088, %v1250_v31  }
  0xfb   : > { %1105 = vrcp.f32 %v509_v38 }
  0xfe   : > { %821 = vperm.xlu1 %1087, %v1243_v29  }
 0x102   : > { %825 = vperm.xlu1 %1087, %v1260_v36  }
 0x105   : > { %v1106_v44 = vpop.eup %1105 }
 0x106   : > { %v514_v45 = vadd.f32 %v1106_v44, %v479_v43  ;;  %v512_v50 = vsel %vm500_vm10, %v1106_v44, 0.0 }
 0x107   : > { %v513_v52 = vadd.f32 %v512_v50, %v478_v51 }
 0x108   : > { %1107 = vrcp.f32 %v514_v45 }
 0x112   : > { %v1108_v53 = vpop.eup %1107 }
 0x113   : > { %v517_v54 = vmul.f32 %v1108_v53, %v513_v52 }
 0x115   : > { %v535_v55 = vpack.c.bf16 %v517_v54, %v517_v54 }
 0x117   : > { %1047 = vmatprep.subr.msk.bf16.mxu0 %vm623_vm11, %v535_v55  ;;  %v625_v56 = vsel %vm623_vm11, %v535_v55, 0 }
 0x118   : > { %1029 = vmatpush3.bf16.msra.mxu0 %v625_v56 }
 0x11b   : > { %1031 = vmatmul.mubr.msk.bf16.vlgmr.msra.gmra.mrb[0].mxu0 %vm616_vm2, %v1092_v57  ;;  %vm852_vm2 = vcmask 125952  }
 0x179   : > { %v814_v21 = vpop.permute.xlu1 %813  ;;  %v818_v35 = vpop.permute.xlu0 %817 }
 0x17d   : > { %v822_v23 = vpop.permute.xlu1 %821 }
 0x181   : > { %v826_v39 = vpop.permute.xlu1 %825 }
 0x1ee   : > { %v1032_v0 = vpop.f32.mrb[0].mxu0 }
 0x1ef   : > { %v698_v2 = vmul.f32 %v1032_v0, %v689_v61  ;;  %v661_v3 = vpop.f32.mrb[1].mxu0 }
 0x1f0   : > { %v696_v4 = vmul.f32 %v679_v47, %v661_v3  ;;  %v1033_v5 = vpop.f32.mrb[2].mxu0 }
 0x1f1   : > { %v718_v28 = vadd.f32 %v710_v1, %v698_v2  ;;  %v699_v7 = vmul.f32 %v1033_v5, %v694_v62  ;;  %v664_v31 = vpop.f32.mrb[3].mxu0 }
 0x1f2   : > { %v716_v8 = vadd.f32 %v702_v63, %v696_v4  ;;  %v697_v29 = vmul.f32 %v684_v59, %v664_v31 }
 0x1f3   : > { %v719_v10 = vadd.f32 %v714_v6, %v699_v7  ;;  %v722_v11 = vmax.f32 %v718_v28, 0.0 }
 0x1f4   : > { %v717_v36 = vadd.f32 %v706_v60, %v697_v29  ;;  %v720_v13 = vmax.f32 %v716_v8, 0.0 }
 0x1f5   : > { %v723_v12 = vmax.f32 %v719_v10, 0.0 }
 0x1f6   : > { %v721_v14 = vmax.f32 %v717_v36, 0.0 }
 0x1f7   : > { %v725_v15 = vpack.c.bf16 %v723_v12, %v722_v11 }
 0x1f8   : > { %v724_v16 = vpack.c.bf16 %v721_v14, %v720_v13 }
 0x1fa   : > { %1034 = vmatprep.subr.bf16.mxu1 %v724_v16 }
 0x1fb   : > { %1035 = vmatpush3.bf16.msra.mxu1 %v724_v16 }
 0x1fc   : > { %1036 = vmatprep.subr.bf16.mxu1 %v725_v15 }
 0x1ff   : > { %1037 = vmatpush3.bf16.msra.mxu1 %v725_v15 }
 0x202   : > { %1039 = vmatmul.mubr.msk.bf16.vlgmr.msra.gmra.mrb[0].mxu1 %vm736_vm12, %v1094_v17 }
 0x2d5   : > { %v1040_v24 = vpop.f32.mrb[0].mxu1 }
 0x2d6   : > { %v810_v25 = vmul.f32 %v1040_v24, %v802_v22  ;;  %v777_v26 = vpop.f32.mrb[1].mxu1 }
 0x2d7   : > { %v808_v27 = vmul.f32 %v794_v18, %v777_v26  ;;  %v1041_v30 = vpop.f32.mrb[2].mxu1 }
 0x2d8   : > { %v830_v32 = vadd.f32 %v822_v23, %v810_v25  ;;  %v811_v33 = vmul.f32 %v1041_v30, %v806_v20  ;;  %v780_v34 = vpop.f32.mrb[3].mxu1 }
 0x2d9   : > { %v828_v37 = vadd.f32 %v814_v21, %v808_v27  ;;  %v809_v38 = vmul.f32 %v798_v19, %v780_v34 }
 0x2da   : > { %v834_v40 = vmax.f32 %v830_v32, 0.0  ;;  %v831_v41 = vadd.f32 %v826_v39, %v811_v33 }
 0x2db   : > { %v832_v42 = vmax.f32 %v828_v37, 0.0  ;;  %v829_v43 = vadd.f32 %v818_v35, %v809_v38 }
 0x2dc   : > { %v1010_v44 = vpack.c.bf16 %v834_v40, %v834_v40  ;;  %v835_v45 = vmax.f32 %v831_v41, 0.0 }
 0x2dd   : > { %v1008_v46 = vpack.c.bf16 %v832_v42, %v832_v42  ;;  %v833_v48 = vmax.f32 %v829_v43, 0.0 }
 0x2de   : > { %855 = vst.msk [vmem:[%s371_s20 + $0x8] sm:$0xf] %vm852_vm2, %v1010_v44  ;;  %v1011_v49 = vpack.c.bf16 %v835_v45, %v835_v45 }
 0x2df   : > { %853 = vst.msk [vmem:[%s371_s20] sm:$0xf] %vm852_vm2, %v1008_v46  ;;  %v1009_v50 = vpack.c.bf16 %v833_v48, %v833_v48 }
 0x2e0   : > { %856 = vst.msk [vmem:[%s371_s20 + $0xc] sm:$0xf] %vm852_vm2, %v1011_v49 }
 0x2e1   : > { %854 = vst.msk [vmem:[%s371_s20 + $0x4] sm:$0xf] %vm852_vm2, %v1009_v50 }
 0x2e2 PF: > { %s17_s26 = sadd.s32 1, %s1131_s26   ;;  %s1334_s24 = smov %s1127_s25 }
 0x2e3   : > { %p14_p5 = scmp.ge.s32.totalorder %s17_s26, 4   ;;  %s1335_s25 = smov %s1337_s27 }
 0x2e5   :  { %16 = sbr.rel (!%p14_p5) target bundleno = 2 (0x2), region = 87 }

// kernel: pointnet_fp_forward.3
= control target key start
LH: loop header
LB: loop body
LE: loop exit
PB: predicated region body
PF: predicated region fallthrough
CT: control target
= control target key end

     0   :  { %s2067_s24 = smov 0   ;;  %s2069_s25 = smov 0   ;;  %s2331_s0 = inlined_call_operand.vmem [shape: bf16[2,32,16], index: 0, kind: input, shape index: {}, may-alias: {0,1}]   ;;  %s2332_s1 = inlined_call_operand.vmem [shape: bf16[2,32,16], index: 1, kind: input, shape index: {}, may-alias: {0,1}]   ;;  %s2333_s2 = inlined_call_operand.vmem [shape: bf16[96,32], index: 2, kind: input, shape index: {}]   ;;  %s2334_s3 = inlined_call_operand.vmem [shape: bf16[32,32], index: 3, kind: input, shape index: {}]   ;;  %s2335_s4 = inlined_call_operand.vmem [shape: bf16[32,32], index: 4, kind: input, shape index: {}]   ;;  %s2336_s5 = inlined_call_operand.vmem [shape: bf16[32,32], index: 5, kind: input, shape index: {}]   ;;  %s2337_s6 = inlined_call_operand.vmem [shape: f32[32,10], index: 6, kind: input, shape index: {}]   ;;  %s2338_s7 = inlined_call_operand.vmem [shape: f32[2,32,16], index: 7, kind: output, shape index: {}]  }
   0x1   :  { %s2071_s26 = smov 0  }
   0x2 LB: > { %s29_s27 = sadd.s32 1, %s2009_s25  ;;  %p1702_p0 = scmp.ge.s32.totalorder %s2013_s26, 1  ;;  %s2013_s26 = sphi %s2071_s26, %s17_s26   ;;  %s2009_s25 = sphi %s2069_s25, %s2340_s25   ;;  %s2005_s24 = sphi %s2067_s24, %s2339_s24  }
   0x3   : > { %p31_p1 = scmp.ge.s32.totalorder %s29_s27, 2  ;;  %p266_p2 = scmp.lt.s32.totalorder %s2013_s26, 3 }
   0x5   : > { %s2342_s27 = smov (%p31_p1, %s29_s27), 0  ;;  %p267_p3 = pnand %p1702_p0, %p266_p2 }
   0x6   : > { %p309_p4 = scmp.lt.s32.totalorder (!%p267_p3), %s2005_s24, 1  ;;  %v1939_v0 = vld [vmem:[%s2333_s2] sm:$0xff] (!%p267_p3)   ;;  %vm409_vm0 = vcmask (!%p267_p3), 261120   ;;  %v2099_v2 = vld [vmem:[%s2337_s6 + $0x10] sm:$0xff] (!%p267_p3)  ;;  %v2015_v3 = vmov (!%p267_p3), 0   ;;  %v2110_v5 = vld [vmem:[%s2337_s6 + $0x8] sm:$0xff] (!%p267_p3) }
   0x7   : > { %270 = sbr.rel (%p267_p3) target bundleno = 1980 (0x7bc), region = 48  ;;  %1792 = vmatprep.mubr.msk.bf16.mxu0 (!%p267_p3), %vm409_vm0, %v1939_v0  ;;  %v2094_v1 = vld [vmem:[%s2337_s6] sm:$0xff] (!%p267_p3)  ;;  %1916 = vset.pattern.permute.xlu0 (!%p267_p3), %v2015_v3  ;;  %v1943_v4 = vld [vmem:[%s2333_s2 + $0x10] sm:$0xff] (!%p267_p3)   ;;  %v2122_v6 = vld [vmem:[%s2337_s6 + $0x18] sm:$0xff] (!%p267_p3)  ;;  %v2016_v11 = vmov (!%p267_p3), 1   ;;  %v2017_v16 = vmov (!%p267_p3), 0.0  }
   0x8   : > { %1917 = vset.pattern.permute.xlu1 (!%p267_p3), %v2015_v3  ;;  %369 = vperm.xlu0 (!%p267_p3), %1916, %v2094_v1   ;;  %v1940_v12 = vld [vmem:[%s2333_s2 + $0x8] sm:$0xff] (!%p267_p3)   ;;  %v1944_v13 = vld [vmem:[%s2333_s2 + $0x18] sm:$0xff] (!%p267_p3)   ;;  %v1945_v14 = vld [vmem:[%s2333_s2 + $0x20] sm:$0xff] (!%p267_p3)   ;;  %vm2018_vm1 = vmmov (!%p267_p3), 0   ;;  %vm638_vm2 = vcmask (!%p267_p3), 1043456   ;;  %vm634_vm3 = vcmask (!%p267_p3), 64512  }
   0x9   : > { %379 = vperm.xlu1 (!%p267_p3), %1917, %v2099_v2   ;;  %1800 = vmatprep.mubr.msk.bf16.mxu1 (!%p267_p3), %vm409_vm0, %v1943_v4  ;;  %v1946_v15 = vld [vmem:[%s2333_s2 + $0x28] sm:$0xff] (!%p267_p3)   ;;  %vm683_vm4 = vcmask (!%p267_p3), 130048  }
   0xc   : > { %374 = vperm.xlu0 (!%p267_p3), %1916, %v2110_v5  }
   0xd   : > { %384 = vperm.xlu1 (!%p267_p3), %1917, %v2122_v6  }
   0xe   : > { %s2344_s24 = smov (!%p309_p4, %s2005_s24), 1 }
   0xf   : > { %s1747_s13 = sshll.u32 %s2344_s24, 4  ;;  %s1749_s29 = sshll.u32 %s2344_s24, 5 }
  0x10   : > { %s316_s18 = scalar_lea.vmem %s2331_s0, %s1747_s13  ;;  %s321_s21 = scalar_lea.vmem %s2332_s1, %s1747_s13  ;;  %1918 = vset.pattern.permute.xlu0 %v2016_v11 }
  0x11   : > { %v2124_v7 = vld [vmem:[%s316_s18] sm:$0xff]   ;;  %v2126_v8 = vld [vmem:[%s316_s18 + $0x8] sm:$0xff]   ;;  %1919 = vset.pattern.permute.xlu1 %v2016_v11  ;;  %575 = vperm.xlu0 %1918, %v2094_v1   ;;  %s329_s9 = scalar_lea.vmem %s2338_s7, %s1749_s29 }
  0x12   : > { %v1941_v9 = vld [vmem:[%s321_s21] sm:$0xff]   ;;  %v1942_v10 = vld [vmem:[%s321_s21 + $0x8] sm:$0xff]   ;;  %1788 = vmatprep.subr.bf16.mxu0 %v2124_v7  ;;  %579 = vperm.xlu1 %1919, %v2110_v5  }
  0x13   : > { %1796 = vmatprep.subr.bf16.mxu1 %v1941_v9  ;;  %1789 = vmatpush3.bf16.msra.mxu0 %v2124_v7 }
  0x14   : > { %1797 = vmatpush3.bf16.msra.mxu1 %v1941_v9  ;;  %1790 = vmatprep.subr.bf16.mxu0 %v2126_v8 }
  0x15   : > { %1798 = vmatprep.subr.bf16.mxu1 %v1942_v10  ;;  %587 = vperm.xlu0 %1918, %v2122_v6  }
  0x16   : > { %583 = vperm.xlu1 %1919, %v2099_v2  }
  0x17   : > { %1791 = vmatpush3.bf16.msra.mxu0 %v2126_v8 }
  0x18   : > { %1799 = vmatpush3.bf16.msra.mxu1 %v1942_v10  ;;  %1808 = vmatprep.subr.bf16.mxu0 %v2017_v16 }
  0x19   : > { %1820 = vmatprep.subr.bf16.mxu1 %v2017_v16 }
  0x1a   : > { %1793 = vmatmul.mubr.msk.bf16.vlgmr.msra.gmra.mrb[0].mxu0 %vm409_vm0, %v1940_v12 }
  0x1b   : > { %1801 = vmatmul.mubr.msk.bf16.vlgmr.msra.gmra.mrb[0].mxu1 %vm409_vm0, %v1944_v13  ;;  %1810 = vmatprep.mubr.msk.bf16.mxu0 %vm2018_vm1, %v2017_v16 }
  0x1c   : > { %1804 = vmatprep.mubr.msk.bf16.mxu1 %vm409_vm0, %v1945_v14 }
  0x23   : > { %1805 = vmatmul.mubr.msk.bf16.gmra.mrb[4].mxu1 %vm409_vm0, %v1946_v15 }
  0x24   : > { %1822 = vmatprep.mubr.msk.bf16.mxu1 %vm2018_vm1, %v2017_v16 }
  0x87   : > { %v370_v18 = vpop.permute.xlu0 %369 }
  0x88   : > { %v380_v17 = vpop.permute.xlu1 %379 }
  0x8b   : > { %v375_v20 = vpop.permute.xlu0 %374 }
  0x8c   : > { %v385_v19 = vpop.permute.xlu1 %384 }
  0x90   : > { %v576_v22 = vpop.permute.xlu0 %575 }
  0x91   : > { %v580_v21 = vpop.permute.xlu1 %579 }
  0x94   : > { %v588_v24 = vpop.permute.xlu0 %587 }
  0x95   : > { %v584_v23 = vpop.permute.xlu1 %583 }
  0xed   : > { %v1794_v25 = vpop.f32.mrb[0].mxu0 }
  0xee   : > { %v1802_v26 = vpop.f32.mrb[0].mxu1  ;;  %v450_v27 = vpop.f32.mrb[1].mxu0  ;;  %v459_v34 = vadd.f32 %v1794_v25, %v380_v17 }
  0xef   : > { %v543_v28 = vpop.f32.mrb[1].mxu1  ;;  %v592_v29 = vadd.f32 %v1802_v26, %v584_v23  ;;  %v451_v30 = vadd.f32 %v450_v27, %v370_v18  ;;  %v1795_v31 = vpop.f32.mrb[2].mxu0 }
  0xf0   : > { %v590_v32 = vadd.f32 %v576_v22, %v543_v28  ;;  %v1803_v33 = vpop.f32.mrb[2].mxu1  ;;  %v462_v35 = vadd.f32 %v1795_v31, %v385_v19  ;;  %v453_v36 = vpop.f32.mrb[3].mxu0  ;;  %v893_v52 = vmul.f32 0.35355338, %v459_v34 }
  0xf1   : > { %v895_v37 = vpack.c.bf16 %v592_v29, %v592_v29  ;;  %v593_v38 = vadd.f32 %v1803_v33, %v588_v24  ;;  %v546_v39 = vpop.f32.mrb[3].mxu1  ;;  %v614_v40 = vmul.f32 0.35355338, %v451_v30  ;;  %v454_v41 = vadd.f32 %v453_v36, %v375_v20 }
  0xf2   : > { %v616_v42 = vpack.c.bf16 %v590_v32, %v590_v32  ;;  %v591_v43 = vadd.f32 %v580_v21, %v546_v39  ;;  %v1031_v44 = vmul.f32 0.35355338, %v462_v35  ;;  %v894_v56 = vpack.c.bf16 %v893_v52, %v893_v52 }
  0xf3   : > { %v917_v45 = vsel %vm638_vm2, %v895_v37, 0  ;;  %v1033_v46 = vpack.c.bf16 %v593_v38, %v593_v38  ;;  %v615_v47 = vpack.c.bf16 %v614_v40, %v614_v40  ;;  %v755_v48 = vmul.f32 0.35355338, %v454_v41 }
  0xf4   : > { %v640_v49 = vsel %vm638_vm2, %v616_v42, 0  ;;  %v757_v50 = vpack.c.bf16 %v591_v43, %v591_v43  ;;  %v1032_v55 = vpack.c.bf16 %v1031_v44, %v1031_v44  ;;  %v2019_v32 = vmov 2  }
  0xf5   : > { %v1055_v51 = vsel %vm638_vm2, %v1033_v46, 0  ;;  %1809 = vmatpush3.bf16.msra.mxu0 %v640_v49  ;;  %v756_v53 = vpack.c.bf16 %v755_v48, %v755_v48  ;;  %618 = vxpose.xlu1.c.b16.start.end [1/1] (short) (narrow) %v615_v47, 16 }
  0xf6   : > { %v779_v54 = vsel %vm638_vm2, %v757_v50, 0  ;;  %1814 = vmatprep.subr.bf16.mxu0 %v2017_v16  ;;  %v2166_v57 = vpop.f32.mrb[4].mxu1 }
  0xf7   : > { %1821 = vmatpush3.bf16.msra.mxu1 %v779_v54  ;;  %759 = vxpose.xlu0.c.b16.start.end [1/1] (short) (narrow) %v756_v53, 16  ;;  %v2168_v58 = vpop.f32.mrb[5].mxu1 }
  0xf8   : > { %1832 = vmatprep.subr.bf16.mxu1 %v2017_v16  ;;  %v2170_v59 = vpop.f32.mrb[6].mxu1 }
  0xf9   : > { %1035 = vxpose.xlu1.c.b16.start.end [1/1] (short) (narrow) %v1032_v55, 16  ;;  %v2172_v60 = vpop.f32.mrb[7].mxu1 }
  0xfb   : > { %897 = vxpose.xlu0.c.b16.start.end [1/1] (short) (narrow) %v894_v56, 16 }
  0xfd   : > { %1921 = vset.pattern.permute.xlu1 %v2019_v32 }
 0x104   : > { %1920 = vset.pattern.permute.xlu0 %v2019_v32 }
 0x15b   : > { %v626_v61 = vpop.trf.xlu1 }
 0x15c   : > { %1811 = vmatmul.mubr.msk.bf16.vlgmr.msra.gmra.mrb[4].mxu0 %vm634_vm3, %v626_v61 }
 0x15d   : > { %v767_v62 = vpop.trf.xlu0  ;;  %1816 = vmatprep.mubr.msk.bf16.mxu0 %vm2018_vm1, %v2017_v16 }
 0x15e   : > { %1823 = vmatmul.mubr.msk.bf16.vlgmr.msra.gmra.mrb[8].mxu1 %vm634_vm3, %v767_v62 }
 0x15f   : > { %1833 = vmatpush3.bf16.msra.mxu1 %v917_v45  ;;  %1834 = vmatprep.mubr.msk.bf16.mxu1 %vm2018_vm1, %v2017_v16  ;;  %v1043_v0 = vpop.trf.xlu1 }
 0x160   : > { %1844 = vmatprep.subr.bf16.mxu1 %v2017_v16 }
 0x161   : > { %v905_v63 = vpop.trf.xlu0 }
 0x166   : > { %1835 = vmatmul.mubr.msk.bf16.vlgmr.msra.gmra.mrb[12].mxu1 %vm634_vm3, %v905_v63 }
 0x167   : > { %1845 = vmatpush3.bf16.msra.mxu1 %v1055_v51  ;;  %1846 = vmatprep.mubr.msk.bf16.mxu1 %vm2018_vm1, %v2017_v16 }
 0x16e   : > { %1847 = vmatmul.mubr.msk.bf16.vlgmr.msra.gmra.mrb[16].mxu1 %vm634_vm3, %v1043_v0 }
 0x22f   : > { %v676_v3 = vpop.f32.mrb[4].mxu0 }
 0x230   : > { %v1812_v4 = vpop.f32.mrb[5].mxu0  ;;  %v684_v9 = vsel %vm683_vm4, %v676_v3, -inf }
 0x231   : > { %v815_v10 = vpop.f32.mrb[8].mxu1  ;;  %685 = vmax.xlane.f32.xlu0 %v684_v9  ;;  %v679_v11 = vpop.f32.mrb[6].mxu0 }
 0x232   : > { %v1813_v12 = vpop.f32.mrb[7].mxu0  ;;  %v1824_v13 = vpop.f32.mrb[9].mxu1  ;;  %v687_v14 = vsel %vm683_vm4, %v679_v11, -inf  ;;  %v822_v18 = vsel %vm683_vm4, %v815_v10, -inf }
 0x233   : > { %v818_v15 = vpop.f32.mrb[10].mxu1  ;;  %688 = vmax.xlane.f32.xlu1 %v687_v14 }
 0x234   : > { %v1825_v17 = vpop.f32.mrb[11].mxu1  ;;  %v825_v19 = vsel %vm683_vm4, %v818_v15, -inf }
 0x235   : > { %823 = vmax.xlane.f32.xlu0 %v822_v18 }
 0x237   : > { %826 = vmax.xlane.f32.xlu1 %v825_v19 }
 0x239   : > { %v953_v20 = vpop.f32.mrb[12].mxu1 }
 0x23a   : > { %v1836_v21 = vpop.f32.mrb[13].mxu1  ;;  %v960_v22 = vsel %vm683_vm4, %v953_v20, -inf }
 0x23b   : > { %v956_v23 = vpop.f32.mrb[14].mxu1  ;;  %961 = vmax.xlane.f32.xlu0 %v960_v22 }
 0x23c   : > { %v1837_v24 = vpop.f32.mrb[15].mxu1  ;;  %v963_v25 = vsel %vm683_vm4, %v956_v23, -inf }
 0x23d   : > { %964 = vmax.xlane.f32.xlu1 %v963_v25 }
 0x241   : > { %v1091_v26 = vpop.f32.mrb[16].mxu1 }
 0x242   : > { %v1848_v27 = vpop.f32.mrb[17].mxu1  ;;  %v1098_v28 = vsel %vm683_vm4, %v1091_v26, -inf }
 0x243   : > { %1099 = vmax.xlane.f32.xlu0 %v1098_v28  ;;  %v1094_v29 = vpop.f32.mrb[18].mxu1 }
 0x244   : > { %v1101_v30 = vsel %vm683_vm4, %v1094_v29, -inf  ;;  %v1849_v31 = vpop.f32.mrb[19].mxu1 }
 0x245   : > { %1102 = vmax.xlane.f32.xlu1 %v1101_v30 }
 0x2be   : > { %v686_v33 = vpop.xlane.xlu0 %685 }
 0x2bf   : > { %v690_v34 = vsub.f32 %v676_v3, %v686_v33 }
 0x2c0   : > { %v689_v35 = vpop.xlane.xlu1 %688 }
 0x2c1   : > { %v692_v36 = vmul.f32 1.442695, %v690_v34  ;;  %v691_v37 = vsub.f32 %v679_v11, %v689_v35 }
 0x2c2   : > { %v824_v38 = vpop.xlane.xlu0 %823 }
 0x2c3   : > { %1955 = vpow2.f32 %v692_v36  ;;  %v694_v39 = vmul.f32 1.442695, %v691_v37  ;;  %v828_v40 = vsub.f32 %v815_v10, %v824_v38 }
 0x2c4   : > { %v827_v41 = vpop.xlane.xlu1 %826 }
 0x2c5   : > { %1957 = vpow2.f32 %v694_v39  ;;  %v830_v42 = vmul.f32 1.442695, %v828_v40  ;;  %v829_v43 = vsub.f32 %v818_v15, %v827_v41 }
 0x2c7   : > { %1959 = vpow2.f32 %v830_v42  ;;  %v832_v44 = vmul.f32 1.442695, %v829_v43 }
 0x2c8   : > { %v962_v45 = vpop.xlane.xlu0 %961 }
 0x2c9   : > { %1961 = vpow2.f32 %v832_v44  ;;  %v966_v46 = vsub.f32 %v953_v20, %v962_v45 }
 0x2ca   : > { %v965_v47 = vpop.xlane.xlu1 %964 }
 0x2cb   : > { %v968_v48 = vmul.f32 1.442695, %v966_v46  ;;  %v967_v49 = vsub.f32 %v956_v23, %v965_v47 }
 0x2cd   : > { %v1956_v50 = vpop.eup %1955  ;;  %1963 = vpow2.f32 %v968_v48  ;;  %v970_v51 = vmul.f32 1.442695, %v967_v49 }
 0x2ce   : > { %v696_v52 = vsel %vm683_vm4, %v1956_v50, 0.0 }
 0x2cf   : > { %v1958_v53 = vpop.eup %1957  ;;  %1965 = vpow2.f32 %v970_v51  ;;  %697 = vadd.xlane.f32.xlu0 %v696_v52 }
 0x2d0   : > { %v1100_v54 = vpop.xlane.xlu0 %1099  ;;  %v699_v55 = vsel %vm683_vm4, %v1958_v53, 0.0 }
 0x2d1   : > { %v1960_v56 = vpop.eup %1959  ;;  %v1104_v61 = vsub.f32 %v1091_v26, %v1100_v54  ;;  %700 = vadd.xlane.f32.xlu1 %v699_v55 }
 0x2d2   : > { %v834_v62 = vsel %vm683_vm4, %v1960_v56, 0.0  ;;  %v1103_v14 = vpop.xlane.xlu1 %1102 }
 0x2d3   : > { %v1962_v63 = vpop.eup %1961  ;;  %v1106_v0 = vmul.f32 1.442695, %v1104_v61  ;;  %835 = vadd.xlane.f32.xlu0 %v834_v62  ;;  %v1105_v15 = vsub.f32 %v1094_v29, %v1103_v14 }
 0x2d4   : > { %v837_v3 = vsel %vm683_vm4, %v1962_v63, 0.0 }
 0x2d5   : > { %1967 = vpow2.f32 %v1106_v0  ;;  %838 = vadd.xlane.f32.xlu1 %v837_v3  ;;  %v1108_v17 = vmul.f32 1.442695, %v1105_v15  ;;  %v2020_v3 = vmov 3  }
 0x2d7   : > { %v1964_v4 = vpop.eup %1963  ;;  %1969 = vpow2.f32 %v1108_v17 }
 0x2d8   : > { %v972_v9 = vsel %vm683_vm4, %v1964_v4, 0.0 }
 0x2d9   : > { %v1966_v10 = vpop.eup %1965  ;;  %973 = vadd.xlane.f32.xlu0 %v972_v9 }
 0x2da   : > { %v975_v11 = vsel %vm683_vm4, %v1966_v10, 0.0 }
 0x2db   : > { %976 = vadd.xlane.f32.xlu1 %v975_v11 }
 0x2df   : > { %v2195_v12 = vpop.eup %1967 }
 0x2e0   : > { %v1110_v13 = vsel %vm683_vm4, %v2195_v12, 0.0 }
 0x2e1   : > { %1111 = vadd.xlane.f32.xlu0 %v1110_v13  ;;  %v1970_v18 = vpop.eup %1969 }
 0x2e2   : > { %v1113_v19 = vsel %vm683_vm4, %v1970_v18, 0.0 }
 0x2ec   : > { %599 = vperm.xlu1 %1921, %v2110_v5  }
 0x2f0   : > { %603 = vperm.xlu1 %1921, %v2099_v2  }
 0x2f7   : > { %595 = vperm.xlu0 %1920, %v2094_v1  }
 0x314   : > { %1114 = vadd.xlane.f32.xlu1 %v1113_v19 }
 0x325   : > { %607 = vperm.xlu1 %1921, %v2122_v6  }
 0x329   : > { %1922 = vset.pattern.permute.xlu1 %v2020_v3 }
 0x32a   : > { %1172 = vperm.xlu1 %1922, %v2094_v1  }
 0x32e   : > { %1176 = vperm.xlu1 %1922, %v2110_v5  }
 0x332   : > { %1180 = vperm.xlu1 %1922, %v2099_v2  }
 0x336   : > { %1184 = vperm.xlu1 %1922, %v2122_v6  }
 0x35c   : > { %v698_v20 = vpop.xlane.xlu0 %697 }
 0x35d   : > { %1971 = vrcp.f32 %v698_v20 }
 0x35e   : > { %v701_v21 = vpop.xlane.xlu1 %700 }
 0x35f   : > { %1973 = vrcp.f32 %v701_v21 }
 0x360   : > { %v836_v23 = vpop.xlane.xlu0 %835 }
 0x362   : > { %v839_v22 = vpop.xlane.xlu1 %838 }
 0x363   : > { %1975 = vrcp.f32 %v839_v22 }
 0x364   : > { %1977 = vrcp.f32 %v836_v23 }
 0x366   : > { %v974_v30 = vpop.xlane.xlu0 %973 }
 0x367   : > { %v1972_v24 = vpop.eup %1971 }
 0x368   : > { %v706_v26 = vmul.f32 %v1972_v24, %v1956_v50  ;;  %v977_v28 = vpop.xlane.xlu1 %976 }
 0x369   : > { %v1974_v25 = vpop.eup %1973  ;;  %1979 = vrcp.f32 %v977_v28  ;;  %v1948_v28 = vld [vmem:[%s2334_s3 + $0x8] sm:$0xff]  }
 0x36a   : > { %v707_v27 = vmul.f32 %v1974_v25, %v1958_v53  ;;  %1981 = vrcp.f32 %v974_v30  ;;  %v2023_v30 = vmov 6  }
 0x36c   : > { %v708_v29 = vpack.c.bf16 %v707_v27, %v706_v26  ;;  %v600_v43 = vpop.permute.xlu1 %599 }
 0x36d   : > { %v1976_v32 = vpop.eup %1975  ;;  %v611_v46 = vadd.f32 %v600_v43, %v2172_v60 }
 0x36e   : > { %v713_v31 = vsel %vm683_vm4, %v708_v29, 0  ;;  %v1978_v33 = vpop.eup %1977  ;;  %v1112_v34 = vpop.xlane.xlu0 %1111  ;;  %v845_v35 = vmul.f32 %v1976_v32, %v1962_v63  ;;  %v1949_v29 = vld [vmem:[%s2335_s4] sm:$0xff]  }
 0x36f   : > { %1815 = vmatpush3.bf16.xpose.msra.mxu0 %v713_v31  ;;  %v844_v36 = vmul.f32 %v1978_v33, %v1960_v56  ;;  %v758_v48 = vpack.c.bf16 %v611_v46, %v611_v46  ;;  %1983 = vrcp.f32 %v1112_v34  ;;  %v1252_v34 = vunpack.c.l.bf16 %v2124_v7 }
 0x370   : > { %1826 = vmatprep.subr.bf16.mxu0 %v2017_v16  ;;  %v604_v49 = vpop.permute.xlu1 %603  ;;  %v1255_v46 = vunpack.c.h.bf16 %v2126_v8 }
 0x371   : > { %v846_v39 = vpack.c.bf16 %v845_v35, %v844_v36  ;;  %v612_v51 = vadd.f32 %v2166_v57, %v604_v49 }
 0x373   : > { %v1980_v40 = vpop.eup %1979  ;;  %v851_v44 = vsel %vm683_vm4, %v846_v39, 0  ;;  %v896_v52 = vpack.c.bf16 %v612_v51, %v612_v51  ;;  %v1254_v39 = vunpack.c.l.bf16 %v2126_v8 }
 0x374   : > { %v1982_v42 = vpop.eup %1981  ;;  %v983_v45 = vmul.f32 %v1980_v40, %v1966_v10 }
 0x375   : > { %v982_v47 = vmul.f32 %v1982_v42, %v1964_v4  ;;  %v2021_v4 = vmov 4  }
 0x376   : > { %v596_v37 = vpop.permute.xlu0 %595  ;;  %1924 = vset.pattern.permute.xlu0 %v2021_v4  ;;  %1923 = vset.pattern.permute.xlu1 %v2021_v4 }
 0x377   : > { %v610_v38 = vadd.f32 %v596_v37, %v2168_v58  ;;  %v984_v58 = vpack.c.bf16 %v983_v45, %v982_v47  ;;  %1308 = vperm.xlu0 %1924, %v2110_v5   ;;  %1304 = vperm.xlu1 %1923, %v2094_v1   ;;  %v1253_v37 = vunpack.c.h.bf16 %v2124_v7 }
 0x379   : > { %v617_v41 = vpack.c.bf16 %v610_v38, %v610_v38  ;;  %v989_v50 = vsel %vm683_vm4, %v984_v58, 0  ;;  %v1984_v53 = vpop.eup %1983 }
 0x37a   : > { %v1120_v55 = vmul.f32 %v1984_v53, %v2195_v12 }
 0x37b   : > { %1817 = vmatmul.mubr.msk.bf16.vlgmr.msra.gmra.mrb[8].mxu0 %vm683_vm4, %v617_v41  ;;  %1312 = vperm.xlu0 %1924, %v2099_v2  }
 0x37c   : > { %1827 = vmatpush3.bf16.xpose.msra.mxu0 %v851_v44  ;;  %1828 = vmatprep.mubr.msk.bf16.mxu0 %vm2018_vm1, %v2017_v16 }
 0x37d   : > { %1838 = vmatprep.subr.bf16.mxu0 %v2017_v16 }
 0x383   : > { %1829 = vmatmul.mubr.msk.bf16.vlgmr.msra.gmra.mrb[12].mxu0 %vm683_vm4, %v758_v48 }
 0x384   : > { %1839 = vmatpush3.bf16.xpose.msra.mxu0 %v989_v50  ;;  %1840 = vmatprep.mubr.msk.bf16.mxu0 %vm2018_vm1, %v2017_v16 }
 0x385   : > { %1850 = vmatprep.subr.bf16.mxu0 %v2017_v16 }
 0x38b   : > { %1841 = vmatmul.mubr.msk.bf16.vlgmr.msra.gmra.mrb[16].mxu0 %vm683_vm4, %v896_v52 }
 0x38c   : > { %1852 = vmatprep.mubr.msk.bf16.mxu0 %vm2018_vm1, %v2017_v16  ;;  %v1947_v16 = vld [vmem:[%s2334_s3] sm:$0xff]  }
 0x38d   : > { %1860 = vmatprep.mubr.msk.bf16.mxu1 %vm409_vm0, %v1947_v16 }
 0x3a1   : > { %v1115_v60 = vpop.xlane.xlu1 %1114 }
 0x3a2   : > { %1985 = vrcp.f32 %v1115_v60 }
 0x3a5   : > { %v608_v62 = vpop.permute.xlu1 %607 }
 0x3a6   : > { %v613_v63 = vadd.f32 %v2170_v59, %v608_v62  ;;  %v2022_v59 = vmov 5  }
 0x3a7   : > { %1927 = vset.pattern.permute.xlu0 %v2022_v59  ;;  %1925 = vset.pattern.permute.xlu1 %v2022_v59 }
 0x3a8   : > { %v1034_v0 = vpack.c.bf16 %v613_v63, %v613_v63  ;;  %1332 = vperm.xlu0 %1927, %v2099_v2   ;;  %1324 = vperm.xlu1 %1925, %v2094_v1  }
 0x3a9   : > { %v1173_v31 = vpop.permute.xlu1 %1172 }
 0x3ac   : > { %v1986_v54 = vpop.eup %1985  ;;  %1328 = vperm.xlu1 %1925, %v2110_v5   ;;  %1930 = vset.pattern.permute.xlu0 %v2023_v30 }
 0x3ad   : > { %v1121_v56 = vmul.f32 %v1986_v54, %v1970_v18  ;;  %1350 = vperm.xlu0 %1930, %v2110_v5   ;;  %v1177_v32 = vpop.permute.xlu1 %1176 }
 0x3af   : > { %v1122_v61 = vpack.c.bf16 %v1121_v56, %v1120_v55 }
 0x3b0   : > { %1926 = vset.pattern.permute.xlu1 %v2021_v4 }
 0x3b1   : > { %v1127_v57 = vsel %vm683_vm4, %v1122_v61, 0  ;;  %1316 = vperm.xlu1 %1926, %v2122_v6   ;;  %v1181_v33 = vpop.permute.xlu1 %1180 }
 0x3b2   : > { %1851 = vmatpush3.bf16.xpose.msra.mxu0 %v1127_v57 }
 0x3b5   : > { %1928 = vset.pattern.permute.xlu1 %v2022_v59  ;;  %v1185_v42 = vpop.permute.xlu1 %1184 }
 0x3b6   : > { %1336 = vperm.xlu1 %1928, %v2122_v6  }
 0x3b9   : > { %1853 = vmatmul.mubr.msk.bf16.vlgmr.msra.gmra.mrb[20].mxu0 %vm683_vm4, %v1034_v0 }
 0x3ba   : > { %1868 = vmatprep.mubr.msk.bf16.mxu0 %vm409_vm0, %v1949_v29  ;;  %1929 = vset.pattern.permute.xlu1 %v2023_v30 }
 0x3bb   : > { %1346 = vperm.xlu1 %1929, %v2094_v1  }
 0x3bf   : > { %1354 = vperm.xlu1 %1929, %v2099_v2  }
 0x3c3   : > { %1358 = vperm.xlu1 %1929, %v2122_v6  }
 0x3f6   : > { %v1309_v30 = vpop.permute.xlu0 %1308 }
 0x44e   : > { %v749_v9 = vpop.f32.mrb[8].mxu0 }
 0x44f   : > { %v1818_v10 = vpop.f32.mrb[9].mxu0 }
 0x450   : > { %v752_v11 = vpop.f32.mrb[10].mxu0 }
 0x451   : > { %v1819_v12 = vpop.f32.mrb[11].mxu0 }
 0x456   : > { %v887_v13 = vpop.f32.mrb[12].mxu0 }
 0x457   : > { %v1169_v14 = vpack.c.bf16 %v887_v13, %v749_v9  ;;  %v1830_v15 = vpop.f32.mrb[13].mxu0 }
 0x458   : > { %v890_v17 = vpop.f32.mrb[14].mxu0 }
 0x459   : > { %v1831_v18 = vpop.f32.mrb[15].mxu0  ;;  %1856 = vmatprep.subr.bf16.mxu1 %v1169_v14 }
 0x45a   : > { %1857 = vmatpush3.bf16.msra.mxu1 %v1169_v14 }
 0x45e   : > { %v1025_v19 = vpop.f32.mrb[16].mxu0 }
 0x45f   : > { %v1842_v20 = vpop.f32.mrb[17].mxu0 }
 0x460   : > { %v1028_v21 = vpop.f32.mrb[18].mxu0 }
 0x461   : > { %v1843_v22 = vpop.f32.mrb[19].mxu0 }
 0x48c   : > { %v1163_v23 = vpop.f32.mrb[20].mxu0 }
 0x48d   : > { %v1170_v24 = vpack.c.bf16 %v1163_v23, %v1025_v19  ;;  %v1854_v25 = vpop.f32.mrb[21].mxu0 }
 0x48e   : > { %v1166_v26 = vpop.f32.mrb[22].mxu0 }
 0x48f   : > { %v1855_v27 = vpop.f32.mrb[23].mxu0  ;;  %1858 = vmatprep.subr.bf16.mxu1 %v1170_v24 }
 0x490   : > { %1859 = vmatpush3.bf16.msra.mxu1 %v1170_v24  ;;  %v1305_v24 = vpop.permute.xlu1 %1304 }
 0x493   : > { %1861 = vmatmul.mubr.msk.bf16.vlgmr.msra.gmra.mrb[20].mxu1 %vm409_vm0, %v1948_v28 }
 0x494   : > { %v1325_v28 = vpop.permute.xlu1 %1324 }
 0x566   : > { %v1862_v35 = vpop.f32.mrb[20].mxu1 }
 0x567   : > { %v1237_v36 = vpop.f32.mrb[21].mxu1  ;;  %v1246_v38 = vadd.f32 %v1862_v35, %v1181_v33 }
 0x568   : > { %v1238_v40 = vadd.f32 %v1237_v36, %v1173_v31  ;;  %v1863_v41 = vpop.f32.mrb[22].mxu1  ;;  %v1329_v31 = vpop.permute.xlu1 %1328 }
 0x569   : > { %v1240_v43 = vpop.f32.mrb[23].mxu1  ;;  %v1249_v45 = vadd.f32 %v1863_v41, %v1185_v42  ;;  %v1258_v58 = vadd.f32 %v1254_v39, %v1246_v38 }
 0x56a   : > { %v1256_v44 = vadd.f32 %v1252_v34, %v1238_v40  ;;  %v1241_v47 = vadd.f32 %v1240_v43, %v1177_v32  ;;  %v1313_v32 = vpop.permute.xlu0 %1312 }
 0x56b   : > { %v1259_v50 = vadd.f32 %v1255_v46, %v1249_v45  ;;  %v1263_v52 = vsel %vm683_vm4, %v1258_v58, 0.0 }
 0x56c   : > { %v1257_v48 = vadd.f32 %v1253_v37, %v1241_v47  ;;  %v1260_v49 = vsel %vm683_vm4, %v1256_v44, 0.0  ;;  %v1317_v33 = vpop.permute.xlu1 %1316 }
 0x56d   : > { %v1265_v53 = vsel %vm683_vm4, %v1259_v50, 0.0 }
 0x56e   : > { %v1261_v51 = vsel %vm683_vm4, %v1257_v48, 0.0  ;;  %v1333_v39 = vpop.permute.xlu0 %1332 }
 0x56f   : > { %v1262_v7 = vadd.f32 %v1261_v51, %v1260_v49  ;;  %v1951_v51 = vld [vmem:[%s2336_s5] sm:$0xff]  }
 0x570   : > { %v1337_v40 = vpop.permute.xlu1 %1336  ;;  %1876 = vmatprep.mubr.msk.bf16.mxu1 %vm409_vm0, %v1951_v51 }
 0x571   : > { %v1264_v60 = vadd.f32 %v1263_v52, %v1262_v7  ;;  %v2024_v7 = vmov 7   ;;  %v2025_v52 = vmov 8  }
 0x572   : > { %1932 = vset.pattern.permute.xlu1 %v2024_v7  ;;  %1931 = vset.pattern.permute.xlu0 %v2024_v7 }
 0x573   : > { %v1266_v54 = vadd.f32 %v1265_v53, %v1264_v60  ;;  %1437 = vperm.xlu1 %1932, %v2110_v5   ;;  %1433 = vperm.xlu0 %1931, %v2094_v1   ;;  %v2026_v60 = vmov 9  }
 0x574   : > { %v1347_v53 = vpop.permute.xlu1 %1346 }
 0x575   : > { %v1267_v55 = vrot.slane %v1266_v54, 4 }
 0x577   : > { %v1268_v56 = vadd.f32 %v1267_v55, %v1266_v54  ;;  %1441 = vperm.xlu1 %1932, %v2099_v2   ;;  %1445 = vperm.xlu0 %1931, %v2122_v6  }
 0x578   : > { %v1355_v54 = vpop.permute.xlu1 %1354 }
 0x579   : > { %v1269_v61 = vrot.slane %v1268_v56, 2 }
 0x57b   : > { %v1270_v62 = vadd.f32 %v1269_v61, %v1268_v56  ;;  %1933 = vset.pattern.permute.xlu1 %v2025_v52  ;;  %1934 = vset.pattern.permute.xlu0 %v2025_v52 }
 0x57c   : > { %1560 = vperm.xlu1 %1933, %v2094_v1   ;;  %1564 = vperm.xlu0 %1934, %v2110_v5  }
 0x57d   : > { %v1271_v8 = vrot.slane %v1270_v62, 1 }
 0x57f   : > { %v1272_v57 = vadd.f32 %v1271_v8, %v1270_v62  ;;  %v1351_v62 = vpop.permute.xlu0 %1350  ;;  %v1359_v8 = vpop.permute.xlu1 %1358 }
 0x580   : > { %1568 = vperm.xlu1 %1933, %v2099_v2   ;;  %1935 = vset.pattern.permute.xlu0 %v2026_v60 }
 0x581   : > { %v1274_v63 = vmul.f32 0.03125, %v1272_v57  ;;  %1580 = vperm.xlu0 %1935, %v2094_v1  }
 0x583   : > { %v1276_v0 = vsub.f32 %v1257_v48, %v1274_v63  ;;  %v1277_v16 = vsub.f32 %v1258_v58, %v1274_v63  ;;  %v1278_v3 = vsub.f32 %v1259_v50, %v1274_v63  ;;  %v1275_v4 = vsub.f32 %v1256_v44, %v1274_v63  ;;  %v1950_v50 = vld [vmem:[%s2335_s4 + $0x8] sm:$0xff]  }
 0x584   : > { %1572 = vperm.xlu1 %1933, %v2122_v6  }
 0x585   : > { %v1280_v59 = vmul.f32 %v1276_v0, %v1276_v0  ;;  %v1279_v9 = vmul.f32 %v1275_v4, %v1275_v4  ;;  %v1281_v10 = vmul.f32 %v1277_v16, %v1277_v16  ;;  %v1282_v12 = vmul.f32 %v1278_v3, %v1278_v3  ;;  %1592 = vperm.xlu0 %1935, %v2122_v6  }
 0x587   : > { %v1284_v11 = vsel %vm683_vm4, %v1280_v59, 0.0  ;;  %v1283_v13 = vsel %vm683_vm4, %v1279_v9, 0.0  ;;  %v1286_v15 = vsel %vm683_vm4, %v1281_v10, 0.0  ;;  %v1288_v18 = vsel %vm683_vm4, %v1282_v12, 0.0 }
 0x588   : > { %v1285_v14 = vadd.f32 %v1284_v11, %v1283_v13  ;;  %1936 = vset.pattern.permute.xlu1 %v2026_v60 }
 0x589   : > { %1584 = vperm.xlu1 %1936, %v2110_v5  }
 0x58a   : > { %v1287_v17 = vadd.f32 %v1286_v15, %v1285_v14 }
 0x58c   : > { %v1289_v19 = vadd.f32 %v1288_v18, %v1287_v17 }
 0x58d   : > { %1588 = vperm.xlu1 %1936, %v2099_v2   ;;  %v1952_v2 = vld [vmem:[%s2336_s5 + $0x8] sm:$0xff]  }
 0x58e   : > { %v1290_v20 = vrot.slane %v1289_v19, 4 }
 0x590   : > { %v1291_v21 = vadd.f32 %v1290_v20, %v1289_v19 }
 0x592   : > { %v1292_v22 = vrot.slane %v1291_v21, 2 }
 0x594   : > { %v1293_v23 = vadd.f32 %v1292_v22, %v1291_v21 }
 0x596   : > { %v1294_v25 = vrot.slane %v1293_v23, 1 }
 0x598   : > { %v1295_v26 = vadd.f32 %v1294_v25, %v1293_v23 }
 0x59a   : > { %v1296_v27 = vmul.f32 0.03125, %v1295_v26 }
 0x59c   : > { %v1297_v29 = vadd.f32 1e-05, %v1296_v27 }
 0x59e   : > { %1987 = vrsqrt.f32 %v1297_v29 }
 0x5a8   : > { %v1988_v34 = vpop.eup %1987 }
 0x5a9   : > { %v1299_v35 = vmul.f32 %v1988_v34, %v1275_v4  ;;  %v1300_v36 = vmul.f32 %v1988_v34, %v1276_v0  ;;  %v1301_v37 = vmul.f32 %v1988_v34, %v1277_v16  ;;  %v1302_v38 = vmul.f32 %v1988_v34, %v1278_v3 }
 0x5ab   : > { %v1319_v41 = vmul.f32 %v1305_v24, %v1299_v35  ;;  %v1320_v42 = vmul.f32 %v1309_v30, %v1300_v36  ;;  %v1321_v43 = vmul.f32 %v1313_v32, %v1301_v37  ;;  %v1322_v44 = vmul.f32 %v1317_v33, %v1302_v38 }
 0x5ad   : > { %v2266_v45 = vadd.f32 %v1325_v28, %v1319_v41  ;;  %v2268_v46 = vadd.f32 %v1329_v31, %v1320_v42  ;;  %v2270_v47 = vadd.f32 %v1333_v39, %v1321_v43  ;;  %v2272_v58 = vadd.f32 %v1337_v40, %v1322_v44 }
 0x5af   : > { %v1343_v48 = vpack.c.bf16 %v2268_v46, %v2266_v45  ;;  %v1344_v49 = vpack.c.bf16 %v2272_v58, %v2270_v47 }
 0x5b1   : > { %1864 = vmatprep.subr.bf16.mxu0 %v1343_v48 }
 0x5b2   : > { %1865 = vmatpush3.bf16.msra.mxu0 %v1343_v48 }
 0x5b3   : > { %1866 = vmatprep.subr.bf16.mxu0 %v1344_v49 }
 0x5b6   : > { %1867 = vmatpush3.bf16.msra.mxu0 %v1344_v49 }
 0x5b9   : > { %1869 = vmatmul.mubr.msk.bf16.vlgmr.msra.gmra.mrb[24].mxu0 %vm409_vm0, %v1950_v50 }
 0x5f2   : > { %v1438_v10 = vpop.permute.xlu1 %1437  ;;  %v1434_v11 = vpop.permute.xlu0 %1433 }
 0x5f6   : > { %v1442_v12 = vpop.permute.xlu1 %1441  ;;  %v1446_v15 = vpop.permute.xlu0 %1445 }
 0x68c   : > { %v1870_v55 = vpop.f32.mrb[24].mxu0 }
 0x68d   : > { %v1420_v56 = vadd.f32 %v1870_v55, %v1355_v54  ;;  %v1411_v61 = vpop.f32.mrb[25].mxu0 }
 0x68e   : > { %v1412_v57 = vadd.f32 %v1411_v61, %v1347_v53  ;;  %v1871_v63 = vpop.f32.mrb[26].mxu0 }
 0x68f   : > { %v1423_v0 = vadd.f32 %v1871_v63, %v1359_v8  ;;  %v1414_v1 = vpop.f32.mrb[27].mxu0  ;;  %v1428_v3 = vmax.f32 %v1420_v56, 0.0 }
 0x690   : > { %v1415_v16 = vadd.f32 %v1414_v1, %v1351_v62  ;;  %v1426_v6 = vmax.f32 %v1412_v57, 0.0  ;;  %v1561_v62 = vpop.permute.xlu1 %1560  ;;  %v1565_v1 = vpop.permute.xlu0 %1564 }
 0x691   : > { %v1429_v4 = vmax.f32 %v1423_v0, 0.0 }
 0x692   : > { %v1427_v59 = vmax.f32 %v1415_v16, 0.0 }
 0x693   : > { %v1431_v9 = vpack.c.bf16 %v1429_v4, %v1428_v3 }
 0x694   : > { %v1430_v5 = vpack.c.bf16 %v1427_v59, %v1426_v6  ;;  %v1569_v0 = vpop.permute.xlu1 %1568  ;;  %v1581_v3 = vpop.permute.xlu0 %1580 }
 0x696   : > { %1872 = vmatprep.subr.bf16.mxu1 %v1430_v5 }
 0x697   : > { %1873 = vmatpush3.bf16.msra.mxu1 %v1430_v5 }
 0x698   : > { %1874 = vmatprep.subr.bf16.mxu1 %v1431_v9  ;;  %v1573_v16 = vpop.permute.xlu1 %1572 }
 0x69b   : > { %1875 = vmatpush3.bf16.msra.mxu1 %v1431_v9 }
 0x69c   : > { %v1585_v4 = vpop.permute.xlu1 %1584 }
 0x69e   : > { %1877 = vmatmul.mubr.msk.bf16.vlgmr.msra.gmra.mrb[24].mxu1 %vm409_vm0, %v1952_v2 }
 0x771   : > { %v1878_v13 = vpop.f32.mrb[24].mxu1 }
 0x772   : > { %v1498_v14 = vpop.f32.mrb[25].mxu1  ;;  %v1507_v17 = vadd.f32 %v1878_v13, %v1442_v12 }
 0x773   : > { %v1499_v18 = vadd.f32 %v1498_v14, %v1434_v11  ;;  %v1879_v19 = vpop.f32.mrb[26].mxu1  ;;  %v1593_v14 = vpop.permute.xlu0 %1592 }
 0x774   : > { %v1501_v20 = vpop.f32.mrb[27].mxu1  ;;  %v1510_v22 = vadd.f32 %v1879_v19, %v1446_v15  ;;  %v1515_v24 = vadd.f32 %v1507_v17, %v2270_v47  ;;  %v1589_v15 = vpop.permute.xlu1 %1588 }
 0x775   : > { %v1513_v21 = vadd.f32 %v1499_v18, %v2266_v45  ;;  %v1502_v23 = vadd.f32 %v1501_v20, %v1438_v10 }
 0x776   : > { %v1516_v27 = vadd.f32 %v1510_v22, %v2272_v58  ;;  %v1520_v30 = vsel %vm683_vm4, %v1515_v24, 0.0 }
 0x777   : > { %v1514_v25 = vadd.f32 %v1502_v23, %v2268_v46  ;;  %v1517_v26 = vsel %vm683_vm4, %v1513_v21, 0.0 }
 0x778   : > { %v1522_v32 = vsel %vm683_vm4, %v1516_v27, 0.0 }
 0x779   : > { %v1518_v28 = vsel %vm683_vm4, %v1514_v25, 0.0 }
 0x77a   : > { %v1519_v29 = vadd.f32 %v1518_v28, %v1517_v26 }
 0x77c   : > { %v1521_v31 = vadd.f32 %v1520_v30, %v1519_v29 }
 0x77e   : > { %v1523_v33 = vadd.f32 %v1522_v32, %v1521_v31 }
 0x780   : > { %v1524_v34 = vrot.slane %v1523_v33, 4 }
 0x782   : > { %v1525_v35 = vadd.f32 %v1524_v34, %v1523_v33 }
 0x784   : > { %v1526_v36 = vrot.slane %v1525_v35, 2 }
 0x786   : > { %v1527_v37 = vadd.f32 %v1526_v36, %v1525_v35 }
 0x788   : > { %v1528_v38 = vrot.slane %v1527_v37, 1 }
 0x78a   : > { %v1529_v39 = vadd.f32 %v1528_v38, %v1527_v37 }
 0x78c   : > { %v1530_v40 = vmul.f32 0.03125, %v1529_v39 }
 0x78e   : > { %v1532_v41 = vsub.f32 %v1514_v25, %v1530_v40  ;;  %v1533_v42 = vsub.f32 %v1515_v24, %v1530_v40  ;;  %v1534_v43 = vsub.f32 %v1516_v27, %v1530_v40  ;;  %v1531_v44 = vsub.f32 %v1513_v21, %v1530_v40 }
 0x790   : > { %v1536_v45 = vmul.f32 %v1532_v41, %v1532_v41  ;;  %v1535_v46 = vmul.f32 %v1531_v44, %v1531_v44  ;;  %v1537_v47 = vmul.f32 %v1533_v42, %v1533_v42  ;;  %v1538_v48 = vmul.f32 %v1534_v43, %v1534_v43 }
 0x792   : > { %v1540_v58 = vsel %vm683_vm4, %v1536_v45, 0.0  ;;  %v1539_v49 = vsel %vm683_vm4, %v1535_v46, 0.0  ;;  %v1542_v51 = vsel %vm683_vm4, %v1537_v47, 0.0  ;;  %v1544_v52 = vsel %vm683_vm4, %v1538_v48, 0.0 }
 0x793   : > { %v1541_v50 = vadd.f32 %v1540_v58, %v1539_v49 }
 0x795   : > { %v1543_v7 = vadd.f32 %v1542_v51, %v1541_v50 }
 0x797   : > { %v1545_v60 = vadd.f32 %v1544_v52, %v1543_v7 }
 0x799   : > { %v1546_v53 = vrot.slane %v1545_v60, 4 }
 0x79b   : > { %v1547_v54 = vadd.f32 %v1546_v53, %v1545_v60 }
 0x79d   : > { %v1548_v55 = vrot.slane %v1547_v54, 2 }
 0x79f   : > { %v1549_v56 = vadd.f32 %v1548_v55, %v1547_v54 }
 0x7a1   : > { %v1550_v61 = vrot.slane %v1549_v56, 1 }
 0x7a3   : > { %v1551_v8 = vadd.f32 %v1550_v61, %v1549_v56 }
 0x7a5   : > { %v1552_v57 = vmul.f32 0.03125, %v1551_v8 }
 0x7a7   : > { %v1553_v63 = vadd.f32 1e-05, %v1552_v57 }
 0x7a9   : > { %1989 = vrsqrt.f32 %v1553_v63 }
 0x7b3   : > { %v1990_v6 = vpop.eup %1989 }
 0x7b4   : > { %v1555_v59 = vmul.f32 %v1990_v6, %v1531_v44  ;;  %v1557_v9 = vmul.f32 %v1990_v6, %v1533_v42  ;;  %v1558_v5 = vmul.f32 %v1990_v6, %v1534_v43  ;;  %v1556_v2 = vmul.f32 %v1990_v6, %v1532_v41 }
 0x7b6   : > { %v1575_v10 = vmul.f32 %v1561_v62, %v1555_v59  ;;  %v1577_v11 = vmul.f32 %v1569_v0, %v1557_v9  ;;  %v1578_v12 = vmul.f32 %v1573_v16, %v1558_v5  ;;  %v1576_v13 = vmul.f32 %v1565_v1, %v1556_v2 }
 0x7b8   : > { %v1595_v17 = vadd.f32 %v1581_v3, %v1575_v10  ;;  %v1596_v18 = vadd.f32 %v1585_v4, %v1576_v13  ;;  %v1598_v19 = vadd.f32 %v1593_v14, %v1578_v12  ;;  %v1597_v20 = vadd.f32 %v1589_v15, %v1577_v11 }
 0x7ba   : > { %1599 = vst.msk [vmem:[%s329_s9] sm:$0xff] %vm683_vm4, %v1595_v17  ;;  %1600 = vst.msk [vmem:[%s329_s9 + $0x8] sm:$0xff] %vm683_vm4, %v1596_v18 }
 0x7bb   : > { %1602 = vst.msk [vmem:[%s329_s9 + $0x18] sm:$0xff] %vm683_vm4, %v1598_v19  ;;  %1601 = vst.msk [vmem:[%s329_s9 + $0x10] sm:$0xff] %vm683_vm4, %v1597_v20 }
 0x7bc PF: > { %s17_s26 = sadd.s32 1, %s2013_s26   ;;  %s2339_s24 = smov %s2009_s25 }
 0x7bd   : > { %p14_p5 = scmp.ge.s32.totalorder %s17_s26, 4   ;;  %s2340_s25 = smov %s2342_s27 }
 0x7bf   :  { %16 = sbr.rel (!%p14_p5) target bundleno = 2 (0x2), region = 81 }

</bundles_post_ra>
